<compile_context>
chip_gen: v7x
topology: tpu7x:2x2x1
jax: 0.10.0
libtpu: 0.0.40
codegen_flags: <defaults>
</compile_context>

<pallas_src>
import jax
import jax.numpy as jnp
from jax import lax
from jax.experimental import pallas as pl
from jax.experimental.pallas import tpu as pltpu

# -----------------------------------------------------------------------------
# Problem sizes (batch=128 is hard-coded by the module's .view(1, 128, -1)).
# -----------------------------------------------------------------------------
BATCH = 128        # fixed by forward(): .view(1, 128, -1)
VOCAB = 256        # input_size  (embedding rows)
HIDDEN = 128       # hidden_size (embedding dim == GRU input == GRU hidden)


def _batch_tiles():
    """2-way batch split only on v7x (2 TensorCores/chip); 1 on v5e/v6e."""
    try:
        kind = jax.devices()[0].device_kind.lower()
    except Exception:
        kind = ""
    return 2 if ("v7" in kind or "tpu7" in kind) else 1


def _encoder_gru_kernel(ids_ref, w_fold_ref, w_hh_ref, b_ih_ref, b_hh_ref,
                        h0_ref, out_ref):
    Bt = ids_ref.shape[0]                      # batch tile
    H = h0_ref.shape[1]
    V = w_fold_ref.shape[0]                    # vocab size

    # ---- one-hot token ids (exact in bf16: values are 0/1) -------------------
    ids = ids_ref[...]                                            # (Bt, 1) int32
    col = lax.broadcasted_iota(jnp.int32, (Bt, V), 1)             # (Bt, V)
    onehot = (ids == col).astype(jnp.bfloat16)                    # (Bt, V)

    h = h0_ref[...]                                               # (Bt, H) f32
    h_bf = h.astype(jnp.bfloat16)

    # ---- input side: embedding folded into W_ih (one K=V dot) ----------------
    gi = jnp.dot(onehot, w_fold_ref[...],
                 preferred_element_type=jnp.float32) + b_ih_ref[...]   # (Bt, 3H)
    # ---- hidden side: full W_hh in one K=H dot (no concat, no zero pad) ------
    gh = jnp.dot(h_bf, w_hh_ref[...],
                 preferred_element_type=jnp.float32) + b_hh_ref[...]   # (Bt, 3H)

    # ---- GRU gates (PyTorch order r, z, n), all elementwise math in f32 ------
    r = jax.nn.sigmoid(gi[:, 0:H] + gh[:, 0:H])
    z = jax.nn.sigmoid(gi[:, H:2 * H] + gh[:, H:2 * H])
    n = jnp.tanh(gi[:, 2 * H:3 * H] + r * gh[:, 2 * H:3 * H])
    # (1-z)*n + z*h  ==  n + z*(h - n)   (saves one VPU multiply)
    out_ref[...] = n + z * (h - n)


def encoder_rnn_forward(ids, hidden, fused, batch_tiles=None):
    """ids: (128,) int32 token ids; hidden: (1, 128, H) f32; fused: fused weights.

    Returns (output, hidden) with shapes ((1, 128, H), (1, 128, H)); they are
    the same array for a single-step, single-layer GRU (documented alias).
    """
    if batch_tiles is None:
        batch_tiles = _batch_tiles()
    assert BATCH % batch_tiles == 0
    tile = BATCH // batch_tiles

    ids2d = ids.reshape(BATCH, 1).astype(jnp.int32)
    h0 = hidden.reshape(BATCH, HIDDEN).astype(jnp.float32)

    h_new = pl.pallas_call(
        _encoder_gru_kernel,
        out_shape=jax.ShapeDtypeStruct((BATCH, HIDDEN), jnp.float32),
        grid=(batch_tiles,),
        in_specs=[
            pl.BlockSpec((tile, 1), lambda i: (i, 0)),                    # ids
            pl.BlockSpec((VOCAB, 3 * HIDDEN), lambda i: (0, 0)),          # W_fold
            pl.BlockSpec((HIDDEN, 3 * HIDDEN), lambda i: (0, 0)),         # W_hh
            pl.BlockSpec((1, 3 * HIDDEN), lambda i: (0, 0)),              # b_ih
            pl.BlockSpec((1, 3 * HIDDEN), lambda i: (0, 0)),              # b_hh
            pl.BlockSpec((tile, HIDDEN), lambda i: (i, 0)),               # h0
        ],
        out_specs=pl.BlockSpec((tile, HIDDEN), lambda i: (i, 0)),
        compiler_params=pltpu.CompilerParams(
            dimension_semantics=("parallel",)),
    )(ids2d, fused["w_fold"], fused["w_hh"], fused["b_ih"], fused["b_hh"], h0)

    out3 = h_new.reshape(1, BATCH, HIDDEN)
    # output == hidden for one step of a one-layer GRU; same array returned.
    return out3, out3


def init_params(key):
    """Raw PyTorch-style parameters (f32)."""
    k_emb, k_wih, k_whh, k_bih, k_bhh = jax.random.split(key, 5)
    scale = 1.0 / jnp.sqrt(HIDDEN)
    return {
        "embedding": jax.random.normal(k_emb, (VOCAB, HIDDEN), jnp.float32),
        # Stored already transposed relative to PyTorch ((3H, H) -> (H, 3H))
        # so x @ W; gate order along the 3H axis is [r, z, n].
        "w_ih": scale * jax.random.normal(k_wih, (HIDDEN, 3 * HIDDEN), jnp.float32),
        "w_hh": scale * jax.random.normal(k_whh, (HIDDEN, 3 * HIDDEN), jnp.float32),
        "b_ih": scale * jax.random.normal(k_bih, (1, 3 * HIDDEN), jnp.float32),
        "b_hh": scale * jax.random.normal(k_bhh, (1, 3 * HIDDEN), jnp.float32),
    }


def fuse_params(params):
    """One-time weight repacking: embedding fold + bf16 cast (no zero padding)."""
    w_fold = params["embedding"] @ params["w_ih"]                 # (V, 3H) f32
    return {
        "w_fold": w_fold.astype(jnp.bfloat16),
        "w_hh": params["w_hh"].astype(jnp.bfloat16),
        "b_ih": params["b_ih"].astype(jnp.float32),
        "b_hh": params["b_hh"].astype(jnp.float32),
    }


def _reference_forward(ids, hidden, params):
    """Pure-JAX f32 reference implementing the PyTorch module semantics."""
    x = params["embedding"][ids]                                  # (B, H)
    h = hidden.reshape(BATCH, HIDDEN)
    gi = x @ params["w_ih"] + params["b_ih"]
    gh = h @ params["w_hh"] + params["b_hh"]
    H = HIDDEN
    r = jax.nn.sigmoid(gi[:, :H] + gh[:, :H])
    z = jax.nn.sigmoid(gi[:, H:2 * H] + gh[:, H:2 * H])
    n = jnp.tanh(gi[:, 2 * H:] + r * gh[:, 2 * H:])
    h_new = (1.0 - z) * n + z * h
    return h_new.reshape(1, BATCH, HIDDEN), h_new.reshape(1, BATCH, HIDDEN)


if __name__ == "__main__":
    key = jax.random.PRNGKey(0)
    k_params, k_ids, k_hid = jax.random.split(key, 3)

    params = init_params(k_params)
    fused = fuse_params(params)                  # one-time repack (not per call)

    ids = jax.random.randint(k_ids, (BATCH,), 0, VOCAB, dtype=jnp.int32)
    hidden0 = 0.1 * jax.random.normal(k_hid, (1, BATCH, HIDDEN), jnp.float32)

    out, hid = encoder_rnn_forward(ids, hidden0, fused)
    out = jax.block_until_ready(out)
    hid = jax.block_until_ready(hid)

    ref_out, ref_hid = _reference_forward(ids, hidden0, params)
    assert out.shape == (1, BATCH, HIDDEN) and hid.shape == (1, BATCH, HIDDEN)
    # bf16 matmul operands -> relaxed tolerance vs the f32 reference.
    assert jnp.allclose(out, ref_out, atol=2e-2, rtol=2e-2)
    assert jnp.allclose(hid, ref_hid, atol=2e-2, rtol=2e-2)

    print("KERNEL_OK")
</pallas_src>

<mosaic_0001>
module attributes {stable_mosaic.version = 11 : i64} {
  func.func @_encoder_gru_kernel(%arg0: i32, %arg1: memref<128x1xi32, #tpu.memory_space<vmem>>, %arg2: memref<256x384xbf16, #tpu.memory_space<vmem>>, %arg3: memref<128x384xbf16, #tpu.memory_space<vmem>>, %arg4: memref<1x384xf32, #tpu.memory_space<vmem>>, %arg5: memref<1x384xf32, #tpu.memory_space<vmem>>, %arg6: memref<128x128xf32, #tpu.memory_space<vmem>>, %arg7: memref<128x128xf32, #tpu.memory_space<vmem>>) attributes {dimension_semantics = [#tpu.dimension_semantics<parallel>], iteration_bounds = array<i64: 1>, scalar_prefetch = 0 : i64, scratch_operands = 0 : i64, tpu.core_type = #tpu.core_type<tc>, window_params = [{transform_indices = @transform_0, window_bounds = array<i64: 128, 1>}, {pipeline_mode = #tpu.pipeline_mode<synchronous>, transform_indices = @transform_1, window_bounds = array<i64: 256, 384>}, {pipeline_mode = #tpu.pipeline_mode<synchronous>, transform_indices = @transform_2, window_bounds = array<i64: 128, 384>}, {pipeline_mode = #tpu.pipeline_mode<synchronous>, transform_indices = @transform_3, window_bounds = array<i64: 1, 384>}, {pipeline_mode = #tpu.pipeline_mode<synchronous>, transform_indices = @transform_4, window_bounds = array<i64: 1, 384>}, {transform_indices = @transform_5, window_bounds = array<i64: 128, 128>}, {transform_indices = @transform_6, window_bounds = array<i64: 128, 128>}]} {
    %c0 = arith.constant 0 : index
    %c0_0 = arith.constant 0 : index
    %0 = vector.load %arg1[%c0, %c0_0] : memref<128x1xi32, #tpu.memory_space<vmem>>, vector<128x1xi32>
    %1 = tpu.iota {dimensions = array<i32: 1>} : vector<128x256xi32>
    %2 = vector.broadcast %0 : vector<128x1xi32> to vector<128x256xi32>
    %3 = arith.cmpi eq, %2, %1 : vector<128x256xi32>
    %4 = arith.extui %3 : vector<128x256xi1> to vector<128x256xi32>
    %5 = arith.sitofp %4 : vector<128x256xi32> to vector<128x256xf32>
    %6 = arith.truncf %5 : vector<128x256xf32> to vector<128x256xbf16>
    %c0_1 = arith.constant 0 : index
    %c0_2 = arith.constant 0 : index
    %7 = vector.load %arg6[%c0_1, %c0_2] : memref<128x128xf32, #tpu.memory_space<vmem>>, vector<128x128xf32>
    %8 = arith.truncf %7 : vector<128x128xf32> to vector<128x128xbf16>
    %c0_3 = arith.constant 0 : index
    %c0_4 = arith.constant 0 : index
    %9 = vector.load %arg2[%c0_3, %c0_4] : memref<256x384xbf16, #tpu.memory_space<vmem>>, vector<256x384xbf16>
    %cst = arith.constant dense<0.000000e+00> : vector<128x384xf32>
    %10 = tpu.matmul %6, %9, %cst {dimension_numbers = #tpu.dot_dimension_numbers<[1], [0], [0], [1], [0, 0, 1, 1], [], []>} : vector<128x256xbf16>, vector<256x384xbf16>, vector<128x384xf32> -> vector<128x384xf32>
    %c0_5 = arith.constant 0 : index
    %c0_6 = arith.constant 0 : index
    %11 = vector.load %arg4[%c0_5, %c0_6] : memref<1x384xf32, #tpu.memory_space<vmem>>, vector<1x384xf32>
    %12 = vector.broadcast %11 : vector<1x384xf32> to vector<128x384xf32>
    %13 = arith.addf %10, %12 : vector<128x384xf32>
    %c0_7 = arith.constant 0 : index
    %c0_8 = arith.constant 0 : index
    %14 = vector.load %arg3[%c0_7, %c0_8] : memref<128x384xbf16, #tpu.memory_space<vmem>>, vector<128x384xbf16>
    %cst_9 = arith.constant dense<0.000000e+00> : vector<128x384xf32>
    %15 = tpu.matmul %8, %14, %cst_9 {dimension_numbers = #tpu.dot_dimension_numbers<[1], [0], [0], [1], [0, 0, 1, 1], [], []>} : vector<128x128xbf16>, vector<128x384xbf16>, vector<128x384xf32> -> vector<128x384xf32>
    %c0_10 = arith.constant 0 : index
    %c0_11 = arith.constant 0 : index
    %16 = vector.load %arg5[%c0_10, %c0_11] : memref<1x384xf32, #tpu.memory_space<vmem>>, vector<1x384xf32>
    %17 = vector.broadcast %16 : vector<1x384xf32> to vector<128x384xf32>
    %18 = arith.addf %15, %17 : vector<128x384xf32>
    %19 = vector.extract_strided_slice %13 {offsets = [0, 0], sizes = [128, 128], strides = [1, 1]} : vector<128x384xf32> to vector<128x128xf32>
    %20 = vector.extract_strided_slice %18 {offsets = [0, 0], sizes = [128, 128], strides = [1, 1]} : vector<128x384xf32> to vector<128x128xf32>
    %21 = arith.addf %19, %20 : vector<128x128xf32>
    %22 = arith.negf %21 : vector<128x128xf32>
    %23 = math.exp %22 : vector<128x128xf32>
    %cst_12 = arith.constant 1.000000e+00 : f32
    %24 = vector.broadcast %cst_12 : f32 to vector<128x128xf32>
    %25 = arith.addf %24, %23 : vector<128x128xf32>
    %26 = arith.divf %24, %25 : vector<128x128xf32>
    %27 = vector.extract_strided_slice %13 {offsets = [0, 128], sizes = [128, 128], strides = [1, 1]} : vector<128x384xf32> to vector<128x128xf32>
    %28 = vector.extract_strided_slice %18 {offsets = [0, 128], sizes = [128, 128], strides = [1, 1]} : vector<128x384xf32> to vector<128x128xf32>
    %29 = arith.addf %27, %28 : vector<128x128xf32>
    %30 = arith.negf %29 : vector<128x128xf32>
    %31 = math.exp %30 : vector<128x128xf32>
    %cst_13 = arith.constant 1.000000e+00 : f32
    %32 = vector.broadcast %cst_13 : f32 to vector<128x128xf32>
    %33 = arith.addf %32, %31 : vector<128x128xf32>
    %34 = arith.divf %32, %33 : vector<128x128xf32>
    %35 = vector.extract_strided_slice %13 {offsets = [0, 256], sizes = [128, 128], strides = [1, 1]} : vector<128x384xf32> to vector<128x128xf32>
    %36 = vector.extract_strided_slice %18 {offsets = [0, 256], sizes = [128, 128], strides = [1, 1]} : vector<128x384xf32> to vector<128x128xf32>
    %37 = arith.mulf %26, %36 : vector<128x128xf32>
    %38 = arith.addf %35, %37 : vector<128x128xf32>
    %39 = math.tanh %38 : vector<128x128xf32>
    %40 = arith.subf %7, %39 : vector<128x128xf32>
    %41 = arith.mulf %34, %40 : vector<128x128xf32>
    %42 = arith.addf %39, %41 : vector<128x128xf32>
    %c0_14 = arith.constant 0 : index
    %c0_15 = arith.constant 0 : index
    %43 = vector.load %arg7[%c0_14, %c0_15] : memref<128x128xf32, #tpu.memory_space<vmem>>, vector<128x128xf32>
    tpu.vector_store %arg7[%c0_14, %c0_15], %42 {strides = array<i32>} : memref<128x128xf32, #tpu.memory_space<vmem>>, vector<128x128xf32>,
    return
  }
  func.func @transform_0(%arg0: i32) -> (i32, i32) {
    %c0_i32 = arith.constant 0 : i32
    %c0_i32_0 = arith.constant 0 : i32
    return %arg0, %c0_i32 : i32, i32
  }
  func.func @transform_1(%arg0: i32) -> (i32, i32) {
    %c0_i32 = arith.constant 0 : i32
    %c0_i32_0 = arith.constant 0 : i32
    %c0_i32_1 = arith.constant 0 : i32
    return %c0_i32, %c0_i32_0 : i32, i32
  }
  func.func @transform_2(%arg0: i32) -> (i32, i32) {
    %c0_i32 = arith.constant 0 : i32
    %c0_i32_0 = arith.constant 0 : i32
    %c0_i32_1 = arith.constant 0 : i32
    return %c0_i32, %c0_i32_0 : i32, i32
  }
  func.func @transform_3(%arg0: i32) -> (i32, i32) {
    %c0_i32 = arith.constant 0 : i32
    %c0_i32_0 = arith.constant 0 : i32
    %c0_i32_1 = arith.constant 0 : i32
    return %c0_i32, %c0_i32_0 : i32, i32
  }
  func.func @transform_4(%arg0: i32) -> (i32, i32) {
    %c0_i32 = arith.constant 0 : i32
    %c0_i32_0 = arith.constant 0 : i32
    %c0_i32_1 = arith.constant 0 : i32
    return %c0_i32, %c0_i32_0 : i32, i32
  }
  func.func @transform_5(%arg0: i32) -> (i32, i32) {
    %c0_i32 = arith.constant 0 : i32
    %c0_i32_0 = arith.constant 0 : i32
    return %arg0, %c0_i32 : i32, i32
  }
  func.func @transform_6(%arg0: i32) -> (i32, i32) {
    %c0_i32 = arith.constant 0 : i32
    %c0_i32_0 = arith.constant 0 : i32
    return %arg0, %c0_i32 : i32, i32
  }
}

</mosaic_0001>

<bundles_post_ra>
// kernel: tpu_custom_call.1
= control target key start
LH: loop header
LB: loop body
LE: loop exit
PB: predicated region body
PF: predicated region fallthrough
CT: control target
= control target key end

     0   :  { %11 = vsyncpa [#allocation3], 0  ;;  %s2958_s0 = inlined_call_operand.vmem [shape: s32[128,1], index: 0, kind: input, shape index: {}]   ;;  %s2959_s1 = inlined_call_operand.hbm [shape: bf16[256,384], index: 1, kind: input, shape index: {}]   ;;  %s2960_s2 = inlined_call_operand.hbm [shape: bf16[128,384], index: 2, kind: input, shape index: {}]   ;;  %s2961_s3 = inlined_call_operand.vmem [shape: f32[1,384], index: 3, kind: input, shape index: {}]   ;;  %s2962_s4 = inlined_call_operand.vmem [shape: f32[1,384], index: 4, kind: input, shape index: {}]   ;;  %s2963_s5 = inlined_call_operand.vmem [shape: f32[128,128], index: 5, kind: input, shape index: {}]   ;;  %s2964_s6 = inlined_call_operand.hbm [shape: f32[128,128], index: 6, kind: output, shape index: {}]  }
   0x1   :  { %12 = vsyncpa [#allocation6], 0 }
   0x2   :  { %13 = vsyncpa [#allocation4], 0  ;;  %s2317_s21 = smov [#allocation2]   ;;  %s2245_s25 = scalar_lea.hbm %s2959_s1, 6144 }
   0x3   :  { %s21_s22 = sshll.u32 %s2317_s21, 4  ;;  %p2246_p0 = scmp.ne.s32.totalorder %s2959_s1, %s2245_s25  ;;  %s22_s22 = int_to_ptr.vmem [resolvable:$true] %s21_s22 }
   0x4   :  { %p2249_p1 = scmp.lt.u32.totalorder %s2245_s25, %s2959_s1 }
   0x6   :  { %p2251_p2 = pnand %p2249_p1, %p2246_p0 }
   0x8   :  { %2254 = shalt.err (!%p2251_p2)
}
   0x9   :  { %s2255_s30 = scalar_lea.vmem %s22_s22, 6144  ;;  %p2260_p4 = scmp.lt.s32.totalorder %s22_s22, %s22_s22 }
   0xa   :  { %p2256_p3 = scmp.ne.s32.totalorder %s22_s22, %s2255_s30  ;;  %p2261_p5 = scmp.lt.s32.totalorder %s2255_s30, %s2255_s30 }
   0xc   :  { %p2262_p6 = por %p2261_p5, %p2260_p4 }
   0xe   :  { %p2263_p7 = pnand %p2262_p6, %p2256_p3 }
  0x10   :  { %2266 = shalt.err (!%p2263_p7)
}
  0x11   :  { %s2318_s7 = smov 192   ;;  %s2319_s8 = smov 12  }
  0x12   :  { %27 = dma.hbm_to_vmem [thread:$0]  %s2959_s1, 6144, %s22_s22, [#allocation3], %s2318_s7, %s2318_s7, %s2319_s8  }
  0x13   :  { %s2320_s11 = smov [#allocation5]   ;;  %s2267_s15 = scalar_lea.hbm %s2960_s2, 3072 }
  0x14   :  { %s33_s12 = sshll.u32 %s2320_s11, 4  ;;  %p2268_p8 = scmp.ne.s32.totalorder %s2960_s2, %s2267_s15  ;;  %s34_s12 = int_to_ptr.vmem [resolvable:$true] %s33_s12 }
  0x15   :  { %p2271_p9 = scmp.lt.u32.totalorder %s2267_s15, %s2960_s2 }
  0x17   :  { %p2273_p10 = pnand %p2271_p9, %p2268_p8 }
  0x19   :  { %2276 = shalt.err (!%p2273_p10)
}
  0x1a   :  { %s2277_s20 = scalar_lea.vmem %s34_s12, 3072  ;;  %p2282_p12 = scmp.lt.s32.totalorder %s34_s12, %s34_s12 }
  0x1b   :  { %p2278_p11 = scmp.ne.s32.totalorder %s34_s12, %s2277_s20  ;;  %p2283_p13 = scmp.lt.s32.totalorder %s2277_s20, %s2277_s20 }
  0x1d   :  { %p2284_p0 = por %p2283_p13, %p2282_p12 }
  0x1f   :  { %p2285_p1 = pnand %p2284_p0, %p2278_p11 }
  0x21   :  { %2288 = shalt.err (!%p2285_p1)
}
  0x22   :  { %39 = dma.hbm_to_vmem [thread:$0]  %s2960_s2, 3072, %s34_s12, [#allocation6], %s2318_s7, %s2318_s7, %s2319_s8  }
  0x23   :  { %2311 = dma.done.wait [#allocation3], 6144  }
  0x24   :  { %2312 = vsyncadd [#allocation3], 4294961152 }
  0x25   :  { %2313 = dma.done.wait [#allocation6], 3072  }
  0x26   :  { %2314 = vsyncadd [#allocation6], 4294964224  ;;  %v2321_v0 = vmov 0   ;;  %v55_v1 = vld [vmem:[%s2958_s0 + $0x10] sm:$0xff]  ;;  %v53_v2 = vld [vmem:[%s2958_s0] sm:$0xff] }
  0x27   :  { %1978 = vset.pattern.permute.xlu1 %v2321_v0  ;;  %1977 = vset.pattern.permute.xlu0 %v2321_v0  ;;  %v56_v3 = vld [vmem:[%s2958_s0 + $0x18] sm:$0xff]  ;;  %v54_v4 = vld [vmem:[%s2958_s0 + $0x8] sm:$0xff]  ;;  %v57_v6 = vld [vmem:[%s2958_s0 + $0x20] sm:$0xff] }
  0x28   :  { %79 = vperm.xlu1 %1978, %v55_v1   ;;  %73 = vperm.xlu0 %1977, %v53_v2   ;;  %v58_v5 = vld [vmem:[%s2958_s0 + $0x28] sm:$0xff]  ;;  %v1979_v7 = vld [vmem:[#allocation2 + $0x4] ss:$12 sps:$4 sm:$0xff]   ;;  %v60_v10 = vld [vmem:[%s2958_s0 + $0x38] sm:$0xff] }
  0x29   :  { %v1981_v8 = vld [vmem:[#allocation2] ss:$12 sps:$4 sm:$0xff]   ;;  %v1982_v9 = vld [vmem:[#allocation2 + $0x1c] ss:$12 sps:$4 sm:$0xff]   ;;  %593 = vmatprep.subr.bf16.mxu0 %v1979_v7  ;;  %v59_v11 = vld [vmem:[%s2958_s0 + $0x30] sm:$0xff] }
  0x2a   :  { %594 = vmatpush1.bf16.msra.mxu0 %v1981_v8  ;;  %v1984_v12 = vld [vmem:[#allocation2 + $0x18] ss:$12 sps:$4 sm:$0xff]   ;;  %v1985_v13 = vld [vmem:[#allocation2 + $0x34] ss:$12 sps:$4 sm:$0xff]   ;;  %v62_v14 = vld [vmem:[%s2958_s0 + $0x48] sm:$0xff] }
  0x2b   :  { %595 = vmatprep.subr.bf16.mxu0 %v1982_v9  ;;  %v61_v15 = vld [vmem:[%s2958_s0 + $0x40] sm:$0xff]  ;;  %v1987_v16 = vld [vmem:[#allocation2 + $0x30] ss:$12 sps:$4 sm:$0xff]   ;;  %v1988_v17 = vld [vmem:[#allocation2 + $0x4c] ss:$12 sps:$4 sm:$0xff]  }
  0x2c   :  { %82 = vperm.xlu1 %1978, %v56_v3   ;;  %76 = vperm.xlu0 %1977, %v54_v4   ;;  %v64_v18 = vld [vmem:[%s2958_s0 + $0x58] sm:$0xff]  ;;  %v63_v19 = vld [vmem:[%s2958_s0 + $0x50] sm:$0xff]  ;;  %v66_v24 = vld [vmem:[%s2958_s0 + $0x68] sm:$0xff]  ;;  %v69_v3 = vlaneseq }
  0x2d   :  { %v2003_v20 = vld [vmem:[#allocation2 + $0xc8] ss:$12 sps:$4 sm:$0xff]   ;;  %v1991_v23 = vld [vmem:[#allocation2 + $0x64] ss:$12 sps:$4 sm:$0xff]   ;;  %v2008_v26 = vld [vmem:[#allocation2 + $0xe0] ss:$12 sps:$4 sm:$0xff]  }
  0x2e   :  { %596 = vmatpush1.bf16.msra.mxu0 %v1984_v12  ;;  %v1990_v21 = vld [vmem:[#allocation2 + $0x48] ss:$12 sps:$4 sm:$0xff]   ;;  %1744 = vmatprep.subr.bf16.mxu1 %v2003_v20  ;;  %v65_v25 = vld [vmem:[%s2958_s0 + $0x60] sm:$0xff]  ;;  %v68_v31 = vld [vmem:[%s2958_s0 + $0x78] sm:$0xff]  ;;  %v2436_v4 = vand.u32 127, %v69_v3 }
  0x2f   :  { %597 = vmatprep.subr.bf16.mxu0 %v1985_v13  ;;  %v2006_v22 = vld [vmem:[#allocation2 + $0x8] ss:$12 sps:$4 sm:$0xff]   ;;  %v1993_v27 = vld [vmem:[#allocation2 + $0x60] ss:$12 sps:$4 sm:$0xff]   ;;  %v2013_v30 = vld [vmem:[#allocation2 + $0xf8] ss:$12 sps:$4 sm:$0xff]  }
  0x30   :  { %88 = vperm.xlu1 %1978, %v58_v5   ;;  %85 = vperm.xlu0 %1977, %v57_v6   ;;  %v1994_v28 = vld [vmem:[#allocation2 + $0x7c] ss:$12 sps:$4 sm:$0xff]   ;;  %v2011_v29 = vld [vmem:[#allocation2 + $0x20] ss:$12 sps:$4 sm:$0xff]   ;;  %v67_v32 = vld [vmem:[%s2958_s0 + $0x70] sm:$0xff]  ;;  %v2439_v7 = vadd.s32 128, %v2436_v4 }
  0x31   :  { %1745 = vmatpush3.bf16.msra.mxu1 %v2006_v22  ;;  %v1996_v33 = vld [vmem:[#allocation2 + $0x78] ss:$12 sps:$4 sm:$0xff]   ;;  %v2018_v35 = vld [vmem:[#allocation2 + $0x110] ss:$12 sps:$4 sm:$0xff]   ;;  %v1997_v36 = vld [vmem:[#allocation2 + $0x94] ss:$12 sps:$4 sm:$0xff]  }
  0x32   :  { %598 = vmatpush1.bf16.msra.mxu0 %v1987_v16  ;;  %1746 = vmatprep.subr.bf16.mxu1 %v2008_v26  ;;  %v2016_v34 = vld [vmem:[#allocation2 + $0x38] ss:$12 sps:$4 sm:$0xff]   ;;  %v2021_v37 = vld [vmem:[#allocation2 + $0x50] ss:$12 sps:$4 sm:$0xff]   ;;  %v2023_v39 = vld [vmem:[#allocation2 + $0x128] ss:$12 sps:$4 sm:$0xff]  }
  0x33   :  { %599 = vmatprep.subr.bf16.mxu0 %v1988_v17  ;;  %v1999_v38 = vld [vmem:[#allocation2 + $0x90] ss:$12 sps:$4 sm:$0xff]   ;;  %v2000_v40 = vld [vmem:[#allocation2 + $0xac] ss:$12 sps:$4 sm:$0xff]   ;;  %v2026_v41 = vld [vmem:[#allocation2 + $0x68] ss:$12 sps:$4 sm:$0xff]  }
  0x34   :  { %94 = vperm.xlu1 %1978, %v60_v10   ;;  %91 = vperm.xlu0 %1977, %v59_v11   ;;  %v2028_v42 = vld [vmem:[#allocation2 + $0x140] ss:$12 sps:$4 sm:$0xff]   ;;  %v2002_v43 = vld [vmem:[#allocation2 + $0xa8] ss:$12 sps:$4 sm:$0xff]   ;;  %v2004_v44 = vld [vmem:[#allocation2 + $0xc4] ss:$12 sps:$4 sm:$0xff]  }
  0x35   :  { %1747 = vmatpush3.bf16.msra.mxu1 %v2011_v29  ;;  %v2031_v45 = vld [vmem:[#allocation2 + $0x80] ss:$12 sps:$4 sm:$0xff]   ;;  %v2033_v46 = vld [vmem:[#allocation2 + $0x158] ss:$12 sps:$4 sm:$0xff]   ;;  %v2009_v48 = vld [vmem:[#allocation2 + $0xdc] ss:$12 sps:$4 sm:$0xff]  }
  0x36   :  { %600 = vmatpush1.bf16.msra.mxu0 %v1990_v21  ;;  %1748 = vmatprep.subr.bf16.mxu1 %v2013_v30  ;;  %v2007_v47 = vld [vmem:[#allocation2 + $0xc0] ss:$12 sps:$4 sm:$0xff]   ;;  %v2036_v49 = vld [vmem:[#allocation2 + $0x98] ss:$12 sps:$4 sm:$0xff]   ;;  %v2038_v50 = vld [vmem:[#allocation2 + $0x170] ss:$12 sps:$4 sm:$0xff]  }
  0x37   :  { %601 = vmatprep.subr.bf16.mxu0 %v1991_v23  ;;  %v2012_v51 = vld [vmem:[#allocation2 + $0xd8] ss:$12 sps:$4 sm:$0xff]   ;;  %v2014_v52 = vld [vmem:[#allocation2 + $0xf4] ss:$12 sps:$4 sm:$0xff]   ;;  %v2041_v53 = vld [vmem:[#allocation2 + $0xb0] ss:$12 sps:$4 sm:$0xff]  }
  0x38   :  { %100 = vperm.xlu1 %1978, %v62_v14   ;;  %97 = vperm.xlu0 %1977, %v61_v15   ;;  %v2045_v54 = vld [vmem:[#allocation5 + $0x4] ss:$12 sps:$4 sm:$0xff]   ;;  %v2019_v56 = vld [vmem:[#allocation2 + $0x10c] ss:$12 sps:$4 sm:$0xff]   ;;  %v2022_v57 = vld [vmem:[#allocation2 + $0x108] ss:$12 sps:$4 sm:$0xff]  }
  0x39   :  { %1749 = vmatpush3.bf16.msra.mxu1 %v2016_v34  ;;  %v2017_v55 = vld [vmem:[#allocation2 + $0xf0] ss:$12 sps:$4 sm:$0xff]   ;;  %v2027_v59 = vld [vmem:[#allocation2 + $0x120] ss:$12 sps:$4 sm:$0xff]   ;;  %v2032_v61 = vld [vmem:[#allocation2 + $0x138] ss:$12 sps:$4 sm:$0xff]  }
  0x3a   :  { %602 = vmatpush1.bf16.msra.mxu0 %v1993_v27  ;;  %1750 = vmatprep.subr.bf16.mxu1 %v2018_v35  ;;  %v2024_v58 = vld [vmem:[#allocation2 + $0x124] ss:$12 sps:$4 sm:$0xff]   ;;  %v2029_v60 = vld [vmem:[#allocation2 + $0x13c] ss:$12 sps:$4 sm:$0xff]   ;;  %v2034_v62 = vld [vmem:[#allocation2 + $0x154] ss:$12 sps:$4 sm:$0xff]  }
  0x3b   :  { %603 = vmatprep.subr.bf16.mxu0 %v1994_v28  ;;  %v2037_v63 = vld [vmem:[#allocation2 + $0x150] ss:$12 sps:$4 sm:$0xff]   ;;  %v2039_v1 = vld [vmem:[#allocation2 + $0x16c] ss:$12 sps:$4 sm:$0xff]   ;;  %v2042_v2 = vld [vmem:[#allocation2 + $0x168] ss:$12 sps:$4 sm:$0xff]  }
  0x3c   :  { %106 = vperm.xlu1 %1978, %v64_v18   ;;  %103 = vperm.xlu0 %1977, %v63_v19   ;;  %v2043_v11 = vld [vmem:[#allocation5] ss:$12 sps:$4 sm:$0xff]   ;;  %v2322_v12 = vmov 1.0|1.0   ;;  %v2048_v13 = vld [vmem:[#allocation5 + $0x1c] ss:$12 sps:$4 sm:$0xff]  }
  0x3d   :  { %1751 = vmatpush3.bf16.msra.mxu1 %v2021_v37  ;;  %v2046_v14 = vld [vmem:[#allocation5 + $0x18] ss:$12 sps:$4 sm:$0xff]   ;;  %v2051_v17 = vld [vmem:[#allocation5 + $0x34] ss:$12 sps:$4 sm:$0xff]   ;;  %v2049_v18 = vld [vmem:[#allocation5 + $0x30] ss:$12 sps:$4 sm:$0xff]  }
  0x3e   :  { %604 = vmatpush1.bf16.msra.mxu0 %v1996_v33  ;;  %1752 = vmatprep.subr.bf16.mxu1 %v2023_v39  ;;  %v2054_v19 = vld [vmem:[#allocation5 + $0x4c] ss:$12 sps:$4 sm:$0xff]   ;;  %v2052_v22 = vld [vmem:[#allocation5 + $0x48] ss:$12 sps:$4 sm:$0xff]   ;;  %v2057_v23 = vld [vmem:[#allocation5 + $0x64] ss:$12 sps:$4 sm:$0xff]  }
  0x3f   :  { %605 = vmatprep.subr.bf16.mxu0 %v1997_v36  ;;  %v2058_v28 = vld [vmem:[#allocation5 + $0x78] ss:$12 sps:$4 sm:$0xff]   ;;  %v2063_v29 = vld [vmem:[#allocation5 + $0x94] ss:$12 sps:$4 sm:$0xff]   ;;  %v2061_v30 = vld [vmem:[#allocation5 + $0x90] ss:$12 sps:$4 sm:$0xff]  }
  0x40   :  { %112 = vperm.xlu1 %1978, %v66_v24   ;;  %109 = vperm.xlu0 %1977, %v65_v25   ;;  %v2055_v24 = vld [vmem:[#allocation5 + $0x60] ss:$12 sps:$4 sm:$0xff]   ;;  %v2060_v25 = vld [vmem:[#allocation5 + $0x7c] ss:$12 sps:$4 sm:$0xff]   ;;  %s2323_s0 = smov [#allocation7]  }
  0x41   :  { %1753 = vmatpush3.bf16.msra.mxu1 %v2026_v41  ;;  %v2064_v34 = vld [vmem:[#allocation5 + $0xa8] ss:$12 sps:$4 sm:$0xff]   ;;  %s1531_s27 = sshll.u32 %s2323_s0, 4  ;;  %s1532_s27 = int_to_ptr.vmem [resolvable:$true] %s1531_s27 }
  0x42   :  { %606 = vmatpush1.bf16.msra.mxu0 %v1999_v38  ;;  %1754 = vmatprep.subr.bf16.mxu1 %v2028_v42  ;;  %v2067_v35 = vld [vmem:[#allocation5 + $0x8] ss:$12 sps:$4 sm:$0xff]   ;;  %v240_v42 = vld [vmem:[%s2963_s5 + $0x40] sm:$0xff]  ;;  %s2289_s28 = scalar_lea.vmem %s1532_s27, 2048  ;;  %p2294_p3 = scmp.lt.s32.totalorder %s1532_s27, %s1532_s27 }
  0x43   :  { %607 = vmatprep.subr.bf16.mxu0 %v2000_v40  ;;  %v2516_v40 = vld [vmem:[%s2963_s5] sm:$0xff]  ;;  %v2523_v41 = vld [vmem:[%s2963_s5 + $0x8] sm:$0xff]  ;;  %p2290_p2 = scmp.ne.s32.totalorder %s1532_s27, %s2289_s28  ;;  %p2295_p4 = scmp.lt.s32.totalorder %s2289_s28, %s2289_s28 }
  0x44   :  { %118 = vperm.xlu1 %1978, %v68_v31   ;;  %115 = vperm.xlu0 %1977, %v67_v32   ;;  %v2066_v31 = vld [vmem:[#allocation5 + $0xac] ss:$12 sps:$4 sm:$0xff]  }
  0x45   :  { %1755 = vmatpush3.bf16.msra.mxu1 %v2031_v45  ;;  %p2296_p5 = por %p2295_p4, %p2294_p3 }
  0x46   :  { %608 = vmatpush1.bf16.msra.mxu0 %v2002_v43  ;;  %1756 = vmatprep.subr.bf16.mxu1 %v2033_v46  ;;  %v241_v43 = vld [vmem:[%s2963_s5 + $0x48] sm:$0xff] }
  0x47   :  { %609 = vmatprep.subr.bf16.mxu0 %v2004_v44  ;;  %v248_v44 = vpack.c.bf16 %v2523_v41, %v2516_v40  ;;  %v252_v45 = vpack.c.bf16 %v241_v43, %v240_v42  ;;  %v2068_v46 = vld [vmem:[#allocation5 + $0x20] ss:$12 sps:$4 sm:$0xff]   ;;  %p2297_p6 = pnand %p2296_p5, %p2290_p2 }
  0x49   :  { %1757 = vmatpush3.bf16.msra.mxu1 %v2036_v49  ;;  %v242_v49 = vld [vmem:[%s2963_s5 + $0x50] sm:$0xff] }
  0x4a   :  { %610 = vmatpush1.bf16.msra.mxu0 %v2007_v47  ;;  %1758 = vmatprep.subr.bf16.mxu1 %v2038_v50  ;;  %v2536_v47 = vld [vmem:[%s2963_s5 + $0x10] sm:$0xff]  ;;  %v243_v50 = vld [vmem:[%s2963_s5 + $0x58] sm:$0xff] }
  0x4b   :  { %611 = vmatprep.subr.bf16.mxu0 %v2009_v48  ;;  %v2542_v48 = vld [vmem:[%s2963_s5 + $0x18] sm:$0xff] }
  0x4d   :  { %1759 = vmatpush3.bf16.msra.mxu1 %v2041_v53  ;;  %v253_v53 = vpack.c.bf16 %v243_v50, %v242_v49 }
  0x4e   :  { %612 = vmatpush1.bf16.msra.mxu0 %v2012_v51  ;;  %1856 = vmatprep.subr.bf16.mxu1 %v2045_v54  ;;  %v2069_v51 = vld [vmem:[#allocation5 + $0x38] ss:$12 sps:$4 sm:$0xff]  }
  0x4f   :  { %613 = vmatprep.subr.bf16.mxu0 %v2014_v52  ;;  %v249_v52 = vpack.c.bf16 %v2542_v48, %v2536_v47 }
  0x52   :  { %614 = vmatpush1.bf16.msra.mxu0 %v2017_v55  ;;  %v2556_v55 = vld [vmem:[%s2963_s5 + $0x20] sm:$0xff] }
  0x53   :  { %615 = vmatprep.subr.bf16.mxu0 %v2019_v56  ;;  %v2562_v56 = vld [vmem:[%s2963_s5 + $0x28] sm:$0xff] }
  0x56   :  { %616 = vmatpush1.bf16.msra.mxu0 %v2022_v57  ;;  %v244_v57 = vld [vmem:[%s2963_s5 + $0x60] sm:$0xff] }
  0x57   :  { %617 = vmatprep.subr.bf16.mxu0 %v2024_v58  ;;  %v245_v58 = vld [vmem:[%s2963_s5 + $0x68] sm:$0xff] }
  0x5a   :  { %618 = vmatpush1.bf16.msra.mxu0 %v2027_v59  ;;  %v2071_v59 = vld [vmem:[#allocation5 + $0x68] ss:$12 sps:$4 sm:$0xff]  }
  0x5b   :  { %619 = vmatprep.subr.bf16.mxu0 %v2029_v60  ;;  %v250_v60 = vpack.c.bf16 %v2562_v56, %v2556_v55 }
  0x5e   :  { %620 = vmatpush1.bf16.msra.mxu0 %v2032_v61  ;;  %v254_v61 = vpack.c.bf16 %v245_v58, %v244_v57 }
  0x5f   :  { %621 = vmatprep.subr.bf16.mxu0 %v2034_v62  ;;  %v2072_v62 = vld [vmem:[#allocation5 + $0x80] ss:$12 sps:$4 sm:$0xff]  }
  0x62   :  { %622 = vmatpush1.bf16.msra.mxu0 %v2037_v63  ;;  %v238_v63 = vld [vmem:[%s2963_s5 + $0x30] sm:$0xff] }
  0x63   :  { %623 = vmatprep.subr.bf16.mxu0 %v2039_v1  ;;  %v239_v1 = vld [vmem:[%s2963_s5 + $0x38] sm:$0xff] }
  0x66   :  { %624 = vmatpush1.bf16.msra.mxu0 %v2042_v2  ;;  %v246_v2 = vld [vmem:[%s2963_s5 + $0x70] sm:$0xff] }
  0x67   :  { %980 = vmatprep.subr.bf16.mxu0 %v2045_v54  ;;  %v2070_v54 = vld [vmem:[#allocation5 + $0x50] ss:$12 sps:$4 sm:$0xff]  }
  0xa7   :  { %v80_v5 = vpop.permute.xlu1 %79  ;;  %v74_v6 = vpop.permute.xlu0 %73 }
  0xa8   :  { %vm125_vm0 = vcmp.eq.s32.totalorder %v80_v5, %v2439_v7  ;;  %vm120_vm4 = vcmp.eq.s32.totalorder %v74_v6, %v2436_v4  ;;  %vm121_vm7 = vcmp.eq.s32.totalorder %v74_v6, %v2439_v7  ;;  %vm124_vm9 = vcmp.eq.s32.totalorder %v80_v5, %v2436_v4  ;;  %v2073_v5 = vld [vmem:[#allocation5 + $0x98] ss:$12 sps:$4 sm:$0xff]  }
  0xa9   :  { %v251_v6 = vpack.c.bf16 %v239_v1, %v238_v63 }
  0xab   :  { %v83_v8 = vpop.permute.xlu1 %82  ;;  %v77_v9 = vpop.permute.xlu0 %76 }
  0xac   :  { %vm127_vm1 = vcmp.eq.s32.totalorder %v83_v8, %v2439_v7  ;;  %vm122_vm2 = vcmp.eq.s32.totalorder %v77_v9, %v2436_v4  ;;  %vm123_vm3 = vcmp.eq.s32.totalorder %v77_v9, %v2439_v7  ;;  %vm126_vm10 = vcmp.eq.s32.totalorder %v83_v8, %v2436_v4  ;;  %v2074_v8 = vld [vmem:[#allocation5 + $0xb0] ss:$12 sps:$4 sm:$0xff]  }
  0xad   :  { %vm2446_vm5 = vmpackc.low %vm127_vm1, %vm125_vm0 }
  0xae   :  { %vm1626_vm6 = vmpackc.low %vm122_vm2, %vm120_vm4 }
  0xaf   :  { %vm1624_vm8 = vmpackc.low %vm123_vm3, %vm121_vm7  ;;  %v89_v15 = vpop.permute.xlu1 %88  ;;  %v86_v16 = vpop.permute.xlu0 %85 }
  0xb0   :  { %1625 = vmatprep.mubr.msk.bf16.mxu0 %vm1624_vm8, %v2322_v12  ;;  %1657 = vmatprep.mubr.msk.bf16.mxu1 %vm1624_vm8, %v2322_v12  ;;  %vm131_vm11 = vcmp.eq.s32.totalorder %v89_v15, %v2439_v7  ;;  %vm129_vm12 = vcmp.eq.s32.totalorder %v86_v16, %v2439_v7  ;;  %vm1630_vm13 = vmpackc.low %vm126_vm10, %vm124_vm9  ;;  %vm130_vm15 = vcmp.eq.s32.totalorder %v89_v15, %v2436_v4 }
  0xb1   :  { %1627 = vmatmul.mubr.msk.bf16.vlgmr.msra.gmra.mrb[0].mxu0 %vm1626_vm6, %v2322_v12  ;;  %1659 = vmatmul.mubr.msk.bf16.vlgmr.msra.gmra.mrb[0].mxu1 %vm1626_vm6, %v2322_v12  ;;  %vm1632_vm14 = vmpackc.low %vm131_vm11, %vm129_vm12  ;;  %vm128_vm0 = vcmp.eq.s32.totalorder %v86_v16, %v2436_v4 }
  0xb2   :  { %1864 = vmatpush1.bf16.msra.mxu1 %v2043_v11  ;;  %1629 = vmatprep.mubr.msk.bf16.mxu0 %vm2446_vm5, %v2322_v12  ;;  %vm1634_vm3 = vmpackc.low %vm130_vm15, %vm128_vm0 }
  0xb3   :  { %1661 = vmatprep.mubr.msk.bf16.mxu1 %vm2446_vm5, %v2322_v12  ;;  %981 = vmatpush1.bf16.msra.mxu0 %v2043_v11  ;;  %v95_v20 = vpop.permute.xlu1 %94  ;;  %v92_v21 = vpop.permute.xlu0 %91 }
  0xb4   :  { %1857 = vmatprep.subr.bf16.mxu1 %v2048_v13  ;;  %982 = vmatprep.subr.bf16.mxu0 %v2048_v13  ;;  %vm135_vm1 = vcmp.eq.s32.totalorder %v95_v20, %v2439_v7  ;;  %vm133_vm2 = vcmp.eq.s32.totalorder %v92_v21, %v2439_v7  ;;  %vm134_vm5 = vcmp.eq.s32.totalorder %v95_v20, %v2436_v4 }
  0xb5   :  { %vm1636_vm4 = vmpackc.low %vm135_vm1, %vm133_vm2  ;;  %vm132_vm6 = vcmp.eq.s32.totalorder %v92_v21, %v2436_v4 }
  0xb6   :  { %1865 = vmatpush1.bf16.msra.mxu1 %v2046_v14  ;;  %vm1638_vm9 = vmpackc.low %vm134_vm5, %vm132_vm6 }
  0xb7   :  { %1858 = vmatprep.subr.bf16.mxu1 %v2051_v17  ;;  %983 = vmatpush1.bf16.msra.mxu0 %v2046_v14  ;;  %v101_v26 = vpop.permute.xlu1 %100  ;;  %v98_v27 = vpop.permute.xlu0 %97 }
  0xb8   :  { %984 = vmatprep.subr.bf16.mxu0 %v2051_v17  ;;  %vm139_vm7 = vcmp.eq.s32.totalorder %v101_v26, %v2439_v7  ;;  %vm137_vm8 = vcmp.eq.s32.totalorder %v98_v27, %v2439_v7  ;;  %vm138_vm11 = vcmp.eq.s32.totalorder %v101_v26, %v2436_v4  ;;  %vm136_vm12 = vcmp.eq.s32.totalorder %v98_v27, %v2436_v4 }
  0xb9   :  { %1631 = vmatmul.mubr.msk.bf16.gmra.mrb[4].mxu0 %vm1630_vm13, %v2322_v12  ;;  %1663 = vmatmul.mubr.msk.bf16.gmra.mrb[4].mxu1 %vm1630_vm13, %v2322_v12  ;;  %vm1640_vm10 = vmpackc.low %vm139_vm7, %vm137_vm8 }
  0xba   :  { %1633 = vmatprep.mubr.msk.bf16.mxu0 %vm1632_vm14, %v2322_v12  ;;  %1665 = vmatprep.mubr.msk.bf16.mxu1 %vm1632_vm14, %v2322_v12  ;;  %vm1642_vm15 = vmpackc.low %vm138_vm11, %vm136_vm12 }
  0xbb   :  { %1866 = vmatpush1.bf16.msra.mxu1 %v2049_v18  ;;  %985 = vmatpush1.bf16.msra.mxu0 %v2049_v18  ;;  %v107_v32 = vpop.permute.xlu1 %106  ;;  %v104_v33 = vpop.permute.xlu0 %103 }
  0xbc   :  { %1859 = vmatprep.subr.bf16.mxu1 %v2054_v19  ;;  %986 = vmatprep.subr.bf16.mxu0 %v2054_v19  ;;  %vm143_vm13 = vcmp.eq.s32.totalorder %v107_v32, %v2439_v7  ;;  %vm141_vm14 = vcmp.eq.s32.totalorder %v104_v33, %v2439_v7  ;;  %vm142_vm1 = vcmp.eq.s32.totalorder %v107_v32, %v2436_v4 }
  0xbd   :  { %vm1644_vm0 = vmpackc.low %vm143_vm13, %vm141_vm14  ;;  %vm140_vm2 = vcmp.eq.s32.totalorder %v104_v33, %v2436_v4 }
  0xbe   :  { %vm1646_vm5 = vmpackc.low %vm142_vm1, %vm140_vm2 }
  0xbf   :  { %1867 = vmatpush1.bf16.msra.mxu1 %v2052_v22  ;;  %987 = vmatpush1.bf16.msra.mxu0 %v2052_v22  ;;  %v113_v36 = vpop.permute.xlu1 %112  ;;  %v110_v37 = vpop.permute.xlu0 %109 }
  0xc0   :  { %1860 = vmatprep.subr.bf16.mxu1 %v2057_v23  ;;  %988 = vmatprep.subr.bf16.mxu0 %v2057_v23  ;;  %vm146_vm7 = vcmp.eq.s32.totalorder %v113_v36, %v2436_v4  ;;  %vm144_vm8 = vcmp.eq.s32.totalorder %v110_v37, %v2436_v4 }
  0xc1   :  { %1635 = vmatmul.mubr.msk.bf16.gmra.mrb[8].mxu0 %vm1634_vm3, %v2322_v12  ;;  %1667 = vmatmul.mubr.msk.bf16.gmra.mrb[8].mxu1 %vm1634_vm3, %v2322_v12  ;;  %vm147_vm3 = vcmp.eq.s32.totalorder %v113_v36, %v2439_v7  ;;  %vm1650_vm11 = vmpackc.low %vm146_vm7, %vm144_vm8 }
  0xc2   :  { %1637 = vmatprep.mubr.msk.bf16.mxu0 %vm1636_vm4, %v2322_v12  ;;  %1669 = vmatprep.mubr.msk.bf16.mxu1 %vm1636_vm4, %v2322_v12  ;;  %vm145_vm4 = vcmp.eq.s32.totalorder %v110_v37, %v2439_v7 }
  0xc3   :  { %1868 = vmatpush1.bf16.msra.mxu1 %v2055_v24  ;;  %989 = vmatpush1.bf16.msra.mxu0 %v2055_v24  ;;  %vm1648_vm6 = vmpackc.low %vm147_vm3, %vm145_vm4  ;;  %v119_v38 = vpop.permute.xlu1 %118  ;;  %v116_v39 = vpop.permute.xlu0 %115 }
  0xc4   :  { %1861 = vmatprep.subr.bf16.mxu1 %v2060_v25  ;;  %990 = vmatprep.subr.bf16.mxu0 %v2060_v25  ;;  %vm150_vm13 = vcmp.eq.s32.totalorder %v119_v38, %v2436_v4  ;;  %vm148_vm14 = vcmp.eq.s32.totalorder %v116_v39, %v2436_v4  ;;  %v247_v4 = vld [vmem:[%s2963_s5 + $0x78] sm:$0xff] }
  0xc7   :  { %1869 = vmatpush1.bf16.msra.mxu1 %v2058_v28  ;;  %991 = vmatpush1.bf16.msra.mxu0 %v2058_v28 }
  0xc8   :  { %1862 = vmatprep.subr.bf16.mxu1 %v2063_v29  ;;  %992 = vmatprep.subr.bf16.mxu0 %v2063_v29 }
  0xc9   :  { %1639 = vmatmul.mubr.msk.bf16.gmra.mrb[12].mxu0 %vm1638_vm9, %v2322_v12  ;;  %1671 = vmatmul.mubr.msk.bf16.gmra.mrb[12].mxu1 %vm1638_vm9, %v2322_v12  ;;  %vm151_vm9 = vcmp.eq.s32.totalorder %v119_v38, %v2439_v7 }
  0xca   :  { %1641 = vmatprep.mubr.msk.bf16.mxu0 %vm1640_vm10, %v2322_v12  ;;  %1673 = vmatprep.mubr.msk.bf16.mxu1 %vm1640_vm10, %v2322_v12  ;;  %vm149_vm10 = vcmp.eq.s32.totalorder %v116_v39, %v2439_v7  ;;  %v255_v7 = vpack.c.bf16 %v247_v4, %v246_v2 }
  0xcb   :  { %1870 = vmatpush1.bf16.msra.mxu1 %v2061_v30  ;;  %993 = vmatpush1.bf16.msra.mxu0 %v2061_v30  ;;  %vm1652_vm12 = vmpackc.low %vm151_vm9, %vm149_vm10 }
  0xcc   :  { %1863 = vmatprep.subr.bf16.mxu1 %v2066_v31  ;;  %994 = vmatprep.subr.bf16.mxu0 %v2066_v31 }
  0xcf   :  { %1871 = vmatpush1.bf16.msra.mxu1 %v2064_v34  ;;  %995 = vmatpush1.bf16.msra.mxu0 %v2064_v34 }
  0xd0   :  { %1824 = vmatprep.subr.bf16.mxu1 %v2067_v35 }
  0xd1   :  { %1643 = vmatmul.mubr.msk.bf16.gmra.mrb[16].mxu0 %vm1642_vm15, %v2322_v12  ;;  %1675 = vmatmul.mubr.msk.bf16.gmra.mrb[16].mxu1 %vm1642_vm15, %v2322_v12  ;;  %vm1654_vm15 = vmpackc.low %vm150_vm13, %vm148_vm14 }
  0xd2   :  { %1645 = vmatprep.mubr.msk.bf16.mxu0 %vm1644_vm0, %v2322_v12  ;;  %1677 = vmatprep.mubr.msk.bf16.mxu1 %vm1644_vm0, %v2322_v12 }
  0xd9   :  { %1647 = vmatmul.mubr.msk.bf16.gmra.mrb[20].mxu0 %vm1646_vm5, %v2322_v12  ;;  %1679 = vmatmul.mubr.msk.bf16.gmra.mrb[20].mxu1 %vm1646_vm5, %v2322_v12 }
  0xda   :  { %1649 = vmatprep.mubr.msk.bf16.mxu0 %vm1648_vm6, %v2322_v12  ;;  %1681 = vmatprep.mubr.msk.bf16.mxu1 %vm1648_vm6, %v2322_v12 }
  0xe1   :  { %1651 = vmatmul.mubr.msk.bf16.gmra.mrb[24].mxu0 %vm1650_vm11, %v2322_v12  ;;  %1683 = vmatmul.mubr.msk.bf16.gmra.mrb[24].mxu1 %vm1650_vm11, %v2322_v12 }
  0xe2   :  { %1653 = vmatprep.mubr.msk.bf16.mxu0 %vm1652_vm12, %v2322_v12  ;;  %1685 = vmatprep.mubr.msk.bf16.mxu1 %vm1652_vm12, %v2322_v12 }
  0xe9   :  { %1655 = vmatmul.mubr.msk.bf16.gmra.mrb[28].mxu0 %vm1654_vm15, %v2322_v12  ;;  %1687 = vmatmul.mubr.msk.bf16.gmra.mrb[28].mxu1 %vm1654_vm15, %v2322_v12 }
  0xea   :  { %1012 = vmatprep.mubr.bf16.mxu0 %v2321_v0  ;;  %1052 = vmatprep.mubr.bf16.mxu1 %v2321_v0 }
  0xf1   :  { %1013 = vmatmul.mubr.bf16.vlgmr.msra.gmra.mrb[0].mxu0 %v248_v44  ;;  %1053 = vmatmul.mubr.bf16.vlgmr.msra.gmra.mrb[32].mxu1 %v252_v45 }
  0xf2   :  { %1825 = vmatpush3.bf16.msra.mxu1 %v2067_v35  ;;  %1022 = vmatprep.mubr.bf16.mxu0 %v2321_v0 }
  0xf3   :  { %1826 = vmatprep.subr.bf16.mxu1 %v2068_v46  ;;  %1062 = vmatprep.mubr.bf16.mxu1 %v2321_v0 }
  0xf6   :  { %1827 = vmatpush3.bf16.msra.mxu1 %v2068_v46 }
  0xf7   :  { %1828 = vmatprep.subr.bf16.mxu1 %v2069_v51 }
  0xf9   :  { %1023 = vmatmul.mubr.bf16.gmra.mrb[4].mxu0 %v249_v52  ;;  %1063 = vmatmul.mubr.bf16.gmra.mrb[36].mxu1 %v253_v53 }
  0xfa   :  { %1829 = vmatpush3.bf16.msra.mxu1 %v2069_v51  ;;  %1032 = vmatprep.mubr.bf16.mxu0 %v2321_v0 }
  0xfb   :  { %1830 = vmatprep.subr.bf16.mxu1 %v2070_v54  ;;  %1072 = vmatprep.mubr.bf16.mxu1 %v2321_v0 }
  0xfe   :  { %1831 = vmatpush3.bf16.msra.mxu1 %v2070_v54 }
  0xff   :  { %1832 = vmatprep.subr.bf16.mxu1 %v2071_v59 }
 0x101   :  { %1033 = vmatmul.mubr.bf16.gmra.mrb[8].mxu0 %v250_v60  ;;  %1073 = vmatmul.mubr.bf16.gmra.mrb[40].mxu1 %v254_v61 }
 0x102   :  { %1833 = vmatpush3.bf16.msra.mxu1 %v2071_v59  ;;  %1042 = vmatprep.mubr.bf16.mxu0 %v2321_v0 }
 0x103   :  { %1834 = vmatprep.subr.bf16.mxu1 %v2072_v62  ;;  %1082 = vmatprep.mubr.bf16.mxu1 %v2321_v0 }
 0x106   :  { %1835 = vmatpush3.bf16.msra.mxu1 %v2072_v62 }
 0x107   :  { %1836 = vmatprep.subr.bf16.mxu1 %v2073_v5 }
 0x109   :  { %1043 = vmatmul.mubr.bf16.gmra.mrb[12].mxu0 %v251_v6  ;;  %1083 = vmatmul.mubr.bf16.gmra.mrb[44].mxu1 %v255_v7 }
 0x10a   :  { %1837 = vmatpush3.bf16.msra.mxu1 %v2073_v5  ;;  %1840 = vmatprep.mubr.bf16.mxu1 %v248_v44 }
 0x10b   :  { %1838 = vmatprep.subr.bf16.mxu1 %v2074_v8 }
 0x10e   :  { %1839 = vmatpush3.bf16.msra.mxu1 %v2074_v8 }
 0x111   :  { %1841 = vmatmul.mubr.bf16.vlgmr.msra.gmra.mrb[48].mxu1 %v249_v52 }
 0x112   :  { %1844 = vmatprep.mubr.bf16.mxu1 %v250_v60  ;;  %v2618_v60 = vshrl.u32 %v69_v3, 7  ;;  %v2635_v3 = vld [vmem:[%s2961_s3] sm:$0x7] }
 0x114   :  { %v324_v4 = vsub.s32 0, %v2618_v60 }
 0x119   :  { %1845 = vmatmul.mubr.bf16.gmra.mrb[52].mxu1 %v251_v6 }
 0x11a   :  { %1848 = vmatprep.mubr.bf16.mxu1 %v252_v45 }
 0x121   :  { %1849 = vmatmul.mubr.bf16.gmra.mrb[56].mxu1 %v253_v53 }
 0x122   :  { %1852 = vmatprep.mubr.bf16.mxu1 %v254_v61 }
 0x129   :  { %1853 = vmatmul.mubr.bf16.gmra.mrb[60].mxu1 %v255_v7  ;;  %v328_v7 = vsub.s32 1, %v2618_v60 }
 0x184   :  { %v1760_v0 = vpop.f32.mrb[0].mxu1 }
 0x185   :  { %v1761_v9 = vpop.f32.mrb[1].mxu1 }
 0x186   :  { %v2587_v10 = vadd.f32 %v1761_v9, %v1760_v0  ;;  %v1763_v11 = vpop.f32.mrb[2].mxu1  ;;  %v2638_v0 = vrot.slane %v2635_v3, %v324_v4  ;;  %v2641_v9 = vrot.slane %v2635_v3, %v328_v7 }
 0x187   :  { %v1764_v12 = vpop.f32.mrb[3].mxu1 }
 0x188   :  { %v2589_v13 = vadd.f32 %v1764_v12, %v1763_v11 }
 0x18c   :  { %v1766_v14 = vpop.f32.mrb[4].mxu1 }
 0x18d   :  { %v1767_v15 = vpop.f32.mrb[5].mxu1 }
 0x18e   :  { %v2591_v16 = vadd.f32 %v1767_v15, %v1766_v14  ;;  %v1769_v17 = vpop.f32.mrb[6].mxu1  ;;  %v2648_v14 = vld [vmem:[%s2962_s4] sm:$0x7] }
 0x18f   :  { %v1770_v18 = vpop.f32.mrb[7].mxu1 }
 0x190   :  { %v2593_v19 = vadd.f32 %v1770_v18, %v1769_v17 }
 0x194   :  { %v1772_v20 = vpop.f32.mrb[8].mxu1 }
 0x195   :  { %v1773_v21 = vpop.f32.mrb[9].mxu1 }
 0x196   :  { %v2595_v22 = vadd.f32 %v1773_v21, %v1772_v20  ;;  %v1775_v23 = vpop.f32.mrb[10].mxu1 }
 0x197   :  { %v1776_v24 = vpop.f32.mrb[11].mxu1 }
 0x198   :  { %v2597_v25 = vadd.f32 %v1776_v24, %v1775_v23 }
 0x19c   :  { %v1778_v26 = vpop.f32.mrb[12].mxu1 }
 0x19d   :  { %v1779_v27 = vpop.f32.mrb[13].mxu1 }
 0x19e   :  { %v2599_v28 = vadd.f32 %v1779_v27, %v1778_v26  ;;  %v1781_v29 = vpop.f32.mrb[14].mxu1  ;;  %v2660_v27 = vrot.slane %v2648_v14, %v324_v4 }
 0x19f   :  { %v1782_v30 = vpop.f32.mrb[15].mxu1 }
 0x1a0   :  { %v2601_v31 = vadd.f32 %v1782_v30, %v1781_v29 }
 0x1a2   :  { %2967 = vst [vmem:[#allocation11_spill] sm:$0xff] %v2601_v31 }
 0x1a4   :  { %v667_v32 = vpop.f32.mrb[16].mxu0  ;;  %v1784_v33 = vpop.f32.mrb[16].mxu1 }
 0x1a5   :  { %v669_v34 = vpop.f32.mrb[17].mxu0  ;;  %v1785_v35 = vpop.f32.mrb[17].mxu1  ;;  %v668_v23 = vadd.f32 %v667_v32, %v2638_v0  ;;  %v2672_v32 = vadd.f32 %v2660_v27, %v2638_v0 }
 0x1a6   :  { %v2603_v36 = vadd.f32 %v1785_v35, %v1784_v33  ;;  %v671_v37 = vpop.f32.mrb[18].mxu0  ;;  %v1787_v38 = vpop.f32.mrb[18].mxu1  ;;  %v670_v29 = vadd.f32 %v669_v34, %v2641_v9  ;;  %v2666_v33 = vrot.slane %v2648_v14, %v328_v7 }
 0x1a7   :  { %v673_v39 = vpop.f32.mrb[19].mxu0  ;;  %v1788_v42 = vpop.f32.mrb[19].mxu1  ;;  %v672_v35 = vadd.f32 %v671_v37, %v2638_v0 }
 0x1a8   :  { %v2605_v43 = vadd.f32 %v1788_v42, %v1787_v38  ;;  %v674_v38 = vadd.f32 %v673_v39, %v2641_v9  ;;  %v2676_v42 = vadd.f32 %v2666_v33, %v2641_v9 }
 0x1a9   :  { %v1911_v39 = vadd.f32 %v2660_v27, %v672_v35 }
 0x1ac   :  { %v677_v44 = vpop.f32.mrb[20].mxu0  ;;  %v1790_v45 = vpop.f32.mrb[20].mxu1 }
 0x1ad   :  { %v679_v46 = vpop.f32.mrb[21].mxu0  ;;  %v1791_v49 = vpop.f32.mrb[21].mxu1  ;;  %v678_v4 = vadd.f32 %v677_v44, %v2638_v0 }
 0x1ae   :  { %v2607_v50 = vadd.f32 %v1791_v49, %v1790_v45  ;;  %v2609_v51 = vpop.f32.mrb[22].mxu0  ;;  %v1793_v52 = vpop.f32.mrb[22].mxu1  ;;  %v1905_v45 = vadd.f32 %v2660_v27, %v668_v23 }
 0x1af   :  { %v2611_v53 = vpop.f32.mrb[23].mxu0  ;;  %v1794_v54 = vpop.f32.mrb[23].mxu1  ;;  %v682_v44 = vadd.f32 %v2609_v51, %v2638_v0 }
 0x1b0   :  { %v2613_v57 = vadd.f32 %v1794_v54, %v1793_v52  ;;  %v1908_v52 = vadd.f32 %v2666_v33, %v670_v29 }
 0x1b4   :  { %v2615_v58 = vpop.f32.mrb[24].mxu0  ;;  %v1796_v59 = vpop.f32.mrb[24].mxu1 }
 0x1b5   :  { %v2620_v61 = vpop.f32.mrb[25].mxu0  ;;  %v1797_v62 = vpop.f32.mrb[25].mxu1 }
 0x1b6   :  { %v2622_v63 = vadd.f32 %v1797_v62, %v1796_v59  ;;  %v2624_v1 = vpop.f32.mrb[26].mxu0  ;;  %v1799_v2 = vpop.f32.mrb[26].mxu1 }
 0x1b7   :  { %v2627_v5 = vpop.f32.mrb[27].mxu0  ;;  %v1800_v6 = vpop.f32.mrb[27].mxu1 }
 0x1b8   :  { %v2630_v8 = vadd.f32 %v1800_v6, %v1799_v2  ;;  %v1914_v2 = vadd.f32 %v2666_v33, %v674_v38  ;;  %v680_v6 = vadd.f32 %v679_v46, %v2641_v9  ;;  %v684_v46 = vadd.f32 %v2611_v53, %v2641_v9 }
 0x1b9   :  { %v1923_v53 = vadd.f32 %v2660_v27, %v682_v44 }
 0x1bc   :  { %v2643_v11 = vpop.f32.mrb[28].mxu0  ;;  %v1802_v12 = vpop.f32.mrb[28].mxu1 }
 0x1bd   :  { %v2650_v15 = vpop.f32.mrb[29].mxu0  ;;  %v1803_v17 = vpop.f32.mrb[29].mxu1 }
 0x1be   :  { %v2652_v18 = vadd.f32 %v1803_v17, %v1802_v12  ;;  %v2654_v20 = vpop.f32.mrb[30].mxu0  ;;  %v1805_v21 = vpop.f32.mrb[30].mxu1 }
 0x1bf   :  { %v2657_v24 = vpop.f32.mrb[31].mxu0  ;;  %v1806_v26 = vpop.f32.mrb[31].mxu1 }
 0x1c0   :  { %v2663_v30 = vadd.f32 %v1806_v26, %v1805_v21 }
 0x1c2   :  { %2968 = vst [vmem:[#allocation12_spill] sm:$0xff] %v2663_v30 }
 0x1c4   :  { %v1014_v34 = vpop.f32.mrb[0].mxu0  ;;  %v1054_v49 = vpop.f32.mrb[32].mxu1 }
 0x1c5   :  { %v1873_v54 = vadd.f32 %v2672_v32, %v1014_v34  ;;  %v1906_v59 = vadd.f32 %v1905_v45, %v1054_v49  ;;  %v1016_v37 = vpop.f32.mrb[1].mxu0  ;;  %v1056_v62 = vpop.f32.mrb[33].mxu1 }
 0x1c6   :  { %v1875_v7 = vadd.f32 %v2676_v42, %v1016_v37  ;;  %v1909_v12 = vadd.f32 %v1908_v52, %v1056_v62  ;;  %v1018_v17 = vpop.f32.mrb[2].mxu0  ;;  %v1058_v21 = vpop.f32.mrb[34].mxu1 }
 0x1c7   :  { %v1712_v23 = vmul.f32 -1.442695, %v1873_v54  ;;  %v1720_v26 = vmul.f32 -1.442695, %v1906_v59  ;;  %v1877_v29 = vadd.f32 %v2672_v32, %v1018_v17  ;;  %v1912_v45 = vadd.f32 %v1911_v39, %v1058_v21  ;;  %v1020_v34 = vpop.f32.mrb[3].mxu0  ;;  %v1060_v49 = vpop.f32.mrb[35].mxu1 }
 0x1c8   :  { %v1728_v30 = vmul.f32 -1.442695, %v1875_v7  ;;  %v1736_v35 = vmul.f32 -1.442695, %v1909_v12  ;;  %v1879_v38 = vadd.f32 %v2676_v42, %v1020_v34  ;;  %v1915_v31 = vadd.f32 %v1914_v2, %v1060_v49 }
 0x1c9   :  { %2075 = vpow2.f32 %v1712_v23  ;;  %v1713_v52 = vmul.f32 -1.442695, %v1877_v29  ;;  %v1721_v54 = vmul.f32 -1.442695, %v1912_v45  ;;  %v1917_v59 = vadd.f32 %v2660_v27, %v678_v4 }
 0x1ca   :  { %2077 = vpow2.f32 %v1720_v26  ;;  %v1729_v37 = vmul.f32 -1.442695, %v1879_v38  ;;  %v1920_v7 = vadd.f32 %v2666_v33, %v680_v6  ;;  %v1926_v21 = vadd.f32 %v2666_v33, %v684_v46 }
 0x1cb   :  { %2079 = vpow2.f32 %v1728_v30  ;;  %v688_v30 = vadd.f32 %v2615_v58, %v2638_v0  ;;  %v690_v4 = vadd.f32 %v2620_v61, %v2641_v9  ;;  %v1737_v6 = vmul.f32 -1.442695, %v1915_v31 }
 0x1cc   :  { %2081 = vpow2.f32 %v1736_v35  ;;  %v1024_v62 = vpop.f32.mrb[4].mxu0  ;;  %v1064_v39 = vpop.f32.mrb[36].mxu1  ;;  %v692_v31 = vadd.f32 %v2624_v1, %v2638_v0 }
 0x1cd   :  { %v1881_v2 = vadd.f32 %v2672_v32, %v1024_v62  ;;  %v1918_v12 = vadd.f32 %v1917_v59, %v1064_v39  ;;  %v1026_v51 = vpop.f32.mrb[5].mxu0  ;;  %v1066_v17 = vpop.f32.mrb[37].mxu1  ;;  %2083 = vpow2.f32 %v1713_v52 }
 0x1ce   :  { %v1921_v23 = vadd.f32 %v1920_v7, %v1066_v17  ;;  %v1028_v26 = vpop.f32.mrb[6].mxu0  ;;  %v1068_v29 = vpop.f32.mrb[38].mxu1  ;;  %2085 = vpow2.f32 %v1721_v54  ;;  %v1883_v44 = vadd.f32 %v2676_v42, %v1026_v51  ;;  %v1929_v54 = vadd.f32 %v2660_v27, %v688_v30 }
 0x1cf   :  { %v1714_v45 = vmul.f32 -1.442695, %v1881_v2  ;;  %v1885_v34 = vadd.f32 %v2672_v32, %v1028_v26  ;;  %v2702_v49 = vpop.f32.mrb[7].mxu0  ;;  %v1070_v35 = vpop.f32.mrb[39].mxu1  ;;  %2087 = vpow2.f32 %v1729_v37  ;;  %v1722_v38 = vmul.f32 -1.442695, %v1918_v12 }
 0x1d0   :  { %v2705_v58 = vadd.f32 %v1923_v53, %v1068_v29  ;;  %v2707_v46 = vadd.f32 %v1926_v21, %v1070_v35  ;;  %v694_v37 = vadd.f32 %v2627_v5, %v2641_v9  ;;  %v1730_v62 = vmul.f32 -1.442695, %v1883_v44 }
 0x1d1   :  { %2089 = vpow2.f32 %v1714_v45  ;;  %v1715_v61 = vmul.f32 -1.442695, %v1885_v34  ;;  %v1932_v2 = vadd.f32 %v2666_v33, %v690_v4  ;;  %v1738_v51 = vmul.f32 -1.442695, %v1921_v23 }
 0x1d2   :  { %2091 = vpow2.f32 %v1737_v6  ;;  %v332_v6 = vsub.s32 2, %v2618_v60  ;;  %v1935_v4 = vadd.f32 %v2660_v27, %v692_v31  ;;  %v698_v35 = vadd.f32 %v2643_v11, %v2638_v0 }
 0x1d3   :  { %v2076_v52 = vpop.eup %2075  ;;  %2093 = vpow2.f32 %v1722_v38 }
 0x1d4   :  { %v2078_v59 = vpop.eup %2077  ;;  %v1034_v39 = vpop.f32.mrb[8].mxu0  ;;  %2095 = vpow2.f32 %v1715_v61  ;;  %v1254_v30 = vadd.f32 1.0, %v2076_v52  ;;  %v1938_v61 = vadd.f32 %v2666_v33, %v694_v37 }
 0x1d5   :  { %v1074_v7 = vpop.f32.mrb[40].mxu1  ;;  %v2080_v12 = vpop.eup %2079  ;;  %v1262_v45 = vadd.f32 1.0, %v2078_v59  ;;  %2097 = vpow2.f32 %v1730_v62  ;;  %v702_v59 = vadd.f32 %v2654_v20, %v2638_v0  ;;  %v704_v62 = vadd.f32 %v2657_v24, %v2641_v9 }
 0x1d6   :  { %v2715_v17 = vadd.f32 %v1929_v54, %v1074_v7  ;;  %v2717_v53 = vpop.f32.mrb[9].mxu0  ;;  %v1076_v1 = vpop.f32.mrb[41].mxu1  ;;  %v1366_v38 = vadd.f32 1.0, %v2080_v12  ;;  %v700_v54 = vadd.f32 %v2650_v15, %v2641_v9  ;;  %2099 = vpow2.f32 %v1738_v51 }
 0x1d7   :  { %v2082_v21 = vpop.eup %2081  ;;  %v2719_v26 = vadd.f32 %v1932_v2, %v1076_v1  ;;  %v2721_v29 = vpop.f32.mrb[10].mxu0  ;;  %2101 = vrcp.f32 %v1254_v30  ;;  %v1941_v51 = vadd.f32 %v2660_v27, %v698_v35  ;;  %v1889_v24 = vadd.f32 %v2672_v32, %v1034_v39 }
 0x1d8   :  { %v1078_v5 = vpop.f32.mrb[42].mxu1  ;;  %v2725_v34 = vpop.f32.mrb[11].mxu0  ;;  %v1374_v7 = vadd.f32 1.0, %v2082_v21  ;;  %2103 = vrcp.f32 %v1262_v45  ;;  %v1947_v35 = vadd.f32 %v2660_v27, %v702_v59  ;;  %v2762_v27 = vrot.slane %v2648_v14, %v332_v6 }
 0x1d9   :  { %v2084_v23 = vpop.eup %2083  ;;  %v1080_v44 = vpop.f32.mrb[43].mxu1  ;;  %v2732_v60 = vadd.f32 %v1935_v4, %v1078_v5  ;;  %2105 = vrcp.f32 %v1366_v38  ;;  %v2742_v5 = vrot.slane %v2635_v3, %v332_v6  ;;  %v1944_v4 = vadd.f32 %v2666_v33, %v700_v54 }
 0x1da   :  { %v2086_v52 = vpop.eup %2085  ;;  %v2736_v2 = vadd.f32 %v1938_v61, %v1080_v44  ;;  %v1255_v37 = vadd.f32 1.0, %v2084_v23  ;;  %2107 = vrcp.f32 %v1374_v7  ;;  %v1723_v44 = vmul.f32 -1.442695, %v2705_v58 }
 0x1db   :  { %v2088_v31 = vpop.eup %2087  ;;  %v1263_v12 = vadd.f32 1.0, %v2086_v52  ;;  %v1950_v54 = vadd.f32 %v2666_v33, %v704_v62  ;;  %v1893_v33 = vadd.f32 %v2672_v32, %v2721_v29  ;;  %v741_v14 = vadd.f32 %v2587_v10, %v2742_v5 }
 0x1dc   :  { %v2090_v11 = vpop.eup %2089  ;;  %v1044_v1 = vpop.f32.mrb[12].mxu0  ;;  %v1367_v0 = vadd.f32 1.0, %v2088_v31  ;;  %v1739_v29 = vmul.f32 -1.442695, %v2707_v46  ;;  %v1725_v46 = vmul.f32 -1.442695, %v2732_v60 }
 0x1dd   :  { %v1256_v15 = vadd.f32 1.0, %v2090_v11  ;;  %v2092_v21 = vpop.eup %2091  ;;  %v1084_v20 = vpop.f32.mrb[44].mxu1  ;;  %v1887_v11 = vadd.f32 %v2676_v42, %v2702_v49  ;;  %v1724_v49 = vmul.f32 -1.442695, %v2715_v17  ;;  %v1897_v10 = vadd.f32 %v2672_v32, %v1044_v1 }
 0x1de   :  { %v2744_v30 = vpop.f32.mrb[13].mxu0  ;;  %v2094_v9 = vpop.eup %2093  ;;  %v2748_v45 = vadd.f32 %v1941_v51, %v1084_v20  ;;  %v1375_v39 = vadd.f32 1.0, %v2092_v21  ;;  %v1716_v51 = vmul.f32 -1.442695, %v1889_v24 }
 0x1df   :  { %2109 = vrcp.f32 %v1256_v15  ;;  %v1086_v23 = vpop.f32.mrb[45].mxu1  ;;  %v2750_v38 = vpop.f32.mrb[14].mxu0  ;;  %v1264_v59 = vadd.f32 1.0, %v2094_v9  ;;  %v1731_v6 = vmul.f32 -1.442695, %v1887_v11  ;;  %v1891_v9 = vadd.f32 %v2676_v42, %v2717_v53 }
 0x1e0   :  { %v2096_v3 = vpop.eup %2095  ;;  %2111 = vrcp.f32 %v1255_v37  ;;  %v2754_v61 = vadd.f32 %v1944_v4, %v1086_v23  ;;  %v1088_v52 = vpop.f32.mrb[46].mxu1  ;;  %v744_v4 = vadd.f32 %v2589_v13, %v2742_v5  ;;  %v1717_v23 = vmul.f32 -1.442695, %v1893_v33 }
 0x1e1   :  { %v2756_v7 = vpop.f32.mrb[15].mxu0  ;;  %2113 = vrcp.f32 %v1263_v12  ;;  %v1257_v31 = vadd.f32 1.0, %v2096_v3  ;;  %v1090_v15 = vpop.f32.mrb[47].mxu1  ;;  %v2764_v58 = vadd.f32 %v1947_v35, %v1088_v52  ;;  %v749_v13 = vadd.f32 %v2591_v16, %v2742_v5 }
 0x1e2   :  { %2115 = vrcp.f32 %v1367_v0  ;;  %v2098_v37 = vpop.eup %2097  ;;  %v2768_v62 = vadd.f32 %v1950_v54, %v1090_v15  ;;  %v1732_v15 = vmul.f32 -1.442695, %v1891_v9  ;;  %v1718_v60 = vmul.f32 -1.442695, %v1897_v10 }
 0x1e3   :  { %2117 = vrcp.f32 %v1257_v31  ;;  %v2100_v12 = vpop.eup %2099 }
 0x1e4   :  { %2119 = vpow2.f32 %v1723_v44  ;;  %v2102_v21 = vpop.eup %2101  ;;  %v1842_v0 = vpop.f32.mrb[48].mxu1 }
 0x1e5   :  { %2121 = vrcp.f32 %v1375_v39  ;;  %v2773_v20 = vpop.eup %2103  ;;  %v1127_v24 = vpop.f32.mrb[49].mxu1  ;;  %v1136_v53 = vadd.f32 %v1842_v0, %v2762_v27  ;;  %v1368_v39 = vadd.f32 1.0, %v2098_v37  ;;  %v1726_v37 = vmul.f32 -1.442695, %v2748_v45 }
 0x1e6   :  { %2123 = vrcp.f32 %v1264_v59  ;;  %v2780_v17 = vpop.eup %2105  ;;  %v1128_v35 = vadd.f32 %v1127_v24, %v2762_v27  ;;  %v1843_v3 = vpop.f32.mrb[50].mxu1  ;;  %v1895_v59 = vadd.f32 %v2676_v42, %v2725_v34  ;;  %v1376_v45 = vadd.f32 1.0, %v2100_v12 }
 0x1e7   :  { %2125 = vpow2.f32 %v1716_v51  ;;  %v2784_v44 = vpop.eup %2107  ;;  %v1130_v52 = vpop.f32.mrb[51].mxu1 }
 0x1e8   :  { %2127 = vpow2.f32 %v1724_v49  ;;  %v1414_v31 = vmul.f32 %v2102_v21, %v1128_v35  ;;  %v1131_v1 = vadd.f32 %v1130_v52, %v2762_v27 }
 0x1e9   :  { %v2110_v54 = vpop.eup %2109  ;;  %2129 = vpow2.f32 %v1731_v6  ;;  %v1139_v6 = vadd.f32 %v1843_v3, %v2762_v27 }
 0x1ea   :  { %v2112_v11 = vpop.eup %2111  ;;  %2131 = vpow2.f32 %v1739_v29  ;;  %v1416_v51 = vmul.f32 %v2110_v54, %v1136_v53  ;;  %v2795_v33 = vadd.f32 %v1414_v31, %v741_v14  ;;  %v752_v14 = vadd.f32 %v2593_v19, %v2742_v5 }
 0x1eb   :  { %v2793_v16 = vpop.eup %2113  ;;  %2133 = vpow2.f32 %v1717_v23  ;;  %v1415_v49 = vmul.f32 %v2112_v11, %v1131_v1  ;;  %v1733_v23 = vmul.f32 -1.442695, %v1895_v59  ;;  %v1740_v19 = vmul.f32 -1.442695, %v2719_v26 }
 0x1ec   :  { %v2797_v0 = vpop.eup %2115  ;;  %2135 = vpow2.f32 %v1725_v46  ;;  %v2800_v21 = vadd.f32 %v1416_v51, %v749_v13  ;;  %v2805_v9 = vpop.f32.mrb[52].mxu1  ;;  %v773_v51 = vadd.f32 %v2603_v36, %v2742_v5  ;;  %v776_v26 = vadd.f32 %v2605_v43, %v2742_v5 }
 0x1ed   :  { %v2118_v29 = vpop.eup %2117  ;;  %2137 = vrcp.f32 %v1368_v39  ;;  %v2803_v34 = vadd.f32 %v1415_v49, %v744_v4  ;;  %v1143_v35 = vpop.f32.mrb[53].mxu1  ;;  %v1899_v39 = vadd.f32 %v2676_v42, %v2744_v30  ;;  %v781_v30 = vadd.f32 %v2607_v50, %v2742_v5 }
 0x1ee   :  { %v2120_v24 = vpop.eup %2119  ;;  %2139 = vpow2.f32 %v1732_v15  ;;  %v1417_v10 = vmul.f32 %v2118_v29, %v1139_v6  ;;  %v2811_v3 = vpop.f32.mrb[54].mxu1  ;;  %v1741_v15 = vmul.f32 -1.442695, %v2736_v2  ;;  %v1901_v50 = vadd.f32 %v2672_v32, %v2750_v38 }
 0x1ef   :  { %v2809_v46 = vpop.eup %2121  ;;  %v1265_v13 = vadd.f32 1.0, %v2120_v24  ;;  %2141 = vpow2.f32 %v1718_v60  ;;  %v2815_v52 = vpop.f32.mrb[55].mxu1  ;;  %v1734_v49 = vmul.f32 -1.442695, %v1899_v39 }
 0x1f0   :  { %v2124_v53 = vpop.eup %2123  ;;  %2143 = vpow2.f32 %v1726_v37  ;;  %v2813_v4 = vadd.f32 %v1417_v10, %v752_v14 }
 0x1f1   :  { %v2126_v54 = vpop.eup %2125  ;;  %2145 = vrcp.f32 %v1265_v13 }
 0x1f2   :  { %v2128_v31 = vpop.eup %2127  ;;  %v1258_v1 = vadd.f32 1.0, %v2126_v54  ;;  %2147 = vpow2.f32 %v1733_v23 }
 0x1f3   :  { %v2130_v12 = vpop.eup %2129  ;;  %2149 = vrcp.f32 %v1376_v45  ;;  %v1266_v11 = vadd.f32 1.0, %v2128_v31 }
 0x1f4   :  { %v2132_v59 = vpop.eup %2131  ;;  %2151 = vrcp.f32 %v1258_v1  ;;  %v1850_v37 = vpop.f32.mrb[56].mxu1  ;;  %v1369_v29 = vadd.f32 1.0, %v2130_v12  ;;  %v1742_v1 = vmul.f32 -1.442695, %v2754_v61  ;;  %v784_v61 = vadd.f32 %v2613_v57, %v2742_v5 }
 0x1f5   :  { %v2134_v60 = vpop.eup %2133  ;;  %2153 = vpow2.f32 %v1740_v19  ;;  %v1168_v2 = vadd.f32 %v1850_v37, %v2762_v27  ;;  %v1159_v14 = vpop.f32.mrb[57].mxu1  ;;  %v1377_v36 = vadd.f32 1.0, %v2132_v59  ;;  %v1147_v57 = vadd.f32 %v2815_v52, %v2762_v27 }
 0x1f6   :  { %v2136_v6 = vpop.eup %2135  ;;  %2155 = vrcp.f32 %v1266_v11  ;;  %v1259_v24 = vadd.f32 1.0, %v2134_v60  ;;  %v1160_v43 = vadd.f32 %v1159_v14, %v2762_v27  ;;  %v1851_v45 = vpop.f32.mrb[58].mxu1  ;;  %v1144_v60 = vadd.f32 %v1143_v35, %v2762_v27 }
 0x1f7   :  { %v2828_v23 = vpop.eup %2137  ;;  %v1267_v10 = vadd.f32 1.0, %v2136_v6  ;;  %2157 = vpow2.f32 %v1741_v15  ;;  %v1424_v54 = vmul.f32 %v2124_v53, %v1168_v2  ;;  %v1171_v19 = vadd.f32 %v1851_v45, %v2762_v27  ;;  %v1162_v39 = vpop.f32.mrb[59].mxu1 }
 0x1f8   :  { %v2140_v13 = vpop.eup %2139  ;;  %2159 = vrcp.f32 %v1259_v24  ;;  %v1422_v12 = vmul.f32 %v2773_v20, %v1160_v43  ;;  %v1163_v11 = vadd.f32 %v1162_v39, %v2762_v27  ;;  %v1719_v20 = vmul.f32 -1.442695, %v1901_v50 }
 0x1f9   :  { %v2142_v31 = vpop.eup %2141  ;;  %2161 = vrcp.f32 %v1267_v10  ;;  %v2838_v37 = vadd.f32 %v1424_v54, %v781_v30  ;;  %v757_v35 = vadd.f32 %v2595_v22, %v2742_v5  ;;  %v1727_v30 = vmul.f32 -1.442695, %v2764_v58 }
 0x1fa   :  { %v2144_v15 = vpop.eup %2143  ;;  %2163 = vrcp.f32 %v1369_v29  ;;  %v1260_v59 = vadd.f32 1.0, %v2142_v31  ;;  %v2840_v53 = vadd.f32 %v1422_v12, %v773_v51  ;;  %v1423_v6 = vmul.f32 %v2793_v16, %v1163_v11 }
 0x1fb   :  { %v2146_v32 = vpop.eup %2145  ;;  %2165 = vrcp.f32 %v1377_v36  ;;  %v1268_v38 = vadd.f32 1.0, %v2144_v15  ;;  %v1370_v16 = vadd.f32 1.0, %v2140_v13  ;;  %v789_v13 = vadd.f32 %v2622_v63, %v2742_v5 }
 0x1fc   :  { %v2148_v24 = vpop.eup %2147  ;;  %2167 = vrcp.f32 %v1260_v59  ;;  %v1425_v2 = vmul.f32 %v2146_v32, %v1171_v19  ;;  %v2850_v14 = vadd.f32 %v1423_v6, %v776_v26  ;;  %v1854_v51 = vpop.f32.mrb[60].mxu1  ;;  %v1903_v15 = vadd.f32 %v2676_v42, %v2756_v7 }
 0x1fd   :  { %v2845_v29 = vpop.eup %2149  ;;  %2169 = vrcp.f32 %v1268_v38  ;;  %v1175_v43 = vpop.f32.mrb[61].mxu1  ;;  %v1371_v50 = vadd.f32 1.0, %v2148_v24  ;;  %v792_v32 = vadd.f32 %v2630_v8, %v2742_v5  ;;  %v1184_v38 = vadd.f32 %v1854_v51, %v2762_v27 }
 0x1fe   :  { %v2152_v36 = vpop.eup %2151  ;;  %2171 = vpow2.f32 %v1734_v49  ;;  %v2854_v10 = vadd.f32 %v1425_v2, %v784_v61  ;;  %v1176_v54 = vadd.f32 %v1175_v43, %v2762_v27  ;;  %v2859_v58 = vpop.f32.mrb[62].mxu1  ;;  %v765_v8 = vadd.f32 %v2599_v28, %v2742_v5 }
 0x1ff   :  { %v2856_v45 = vpop.eup %2153  ;;  %2173 = vpow2.f32 %v1742_v1  ;;  %v1418_v22 = vmul.f32 %v2152_v36, %v1144_v60  ;;  %v1178_v49 = vpop.f32.mrb[63].mxu1  ;;  %v760_v1 = vadd.f32 %v2597_v25, %v2742_v5  ;;  %v1152_v25 = vadd.f32 %v2805_v9, %v2762_v27 }
 0x200   :  { %v2156_v26 = vpop.eup %2155  ;;  %2175 = vpow2.f32 %v1719_v20  ;;  %v1179_v31 = vadd.f32 %v1178_v49, %v2762_v27  ;;  %v1743_v9 = vmul.f32 -1.442695, %v2768_v62 }
 0x201   :  { %v2158_v19 = vpop.eup %2157  ;;  %2177 = vpow2.f32 %v1727_v30  ;;  %v1434_v52 = vadd.f32 %v1418_v22, %v757_v35  ;;  %v1426_v39 = vmul.f32 %v2156_v26, %v1176_v54 }
 0x202   :  { %v2160_v12 = vpop.eup %2159  ;;  %2179 = vrcp.f32 %v1370_v16 }
 0x203   :  { %v2162_v11 = vpop.eup %2161  ;;  %2181 = vrcp.f32 %v1371_v50  ;;  %v1419_v59 = vmul.f32 %v2160_v12, %v1147_v57  ;;  %v2868_v63 = vadd.f32 %v1426_v39, %v789_v13  ;;  %v1379_v39 = vadd.f32 1.0, %v2158_v19 }
 0x204   :  { %v2164_v60 = vpop.eup %2163  ;;  %2183 = vtanh.f32 %v2800_v21  ;;  %v1427_v6 = vmul.f32 %v2162_v11, %v1179_v31  ;;  %v1735_v21 = vmul.f32 -1.442695, %v1903_v15 }
 0x205   :  { %v2874_v24 = vpop.eup %2165  ;;  %2185 = vtanh.f32 %v2795_v33  ;;  %v1435_v42 = vadd.f32 %v1419_v59, %v760_v1  ;;  %v797_v33 = vadd.f32 %v2652_v18, %v2742_v5 }
 0x206   :  { %v2168_v7 = vpop.eup %2167  ;;  %2187 = vtanh.f32 %v2813_v4  ;;  %v2880_v61 = vadd.f32 %v1427_v6, %v792_v32 }
 0x207   :  { %v2170_v20 = vpop.eup %2169  ;;  %2189 = vtanh.f32 %v2803_v34  ;;  %v1420_v2 = vmul.f32 %v2168_v7, %v1152_v25  ;;  %v2969_v7 = vld [vmem:[#allocation11_spill] sm:$0xff] }
 0x208   :  { %v2172_v35 = vpop.eup %2171  ;;  %2191 = vtanh.f32 %v1434_v52  ;;  %v1428_v30 = vmul.f32 %v2170_v20, %v1184_v38  ;;  %v768_v20 = vadd.f32 %v2969_v7, %v2742_v5 }
 0x209   :  { %v2174_v51 = vpop.eup %2173  ;;  %v1436_v4 = vadd.f32 %v1420_v2, %v765_v8  ;;  %2193 = vtanh.f32 %v1435_v42  ;;  %v1372_v57 = vadd.f32 1.0, %v2172_v35 }
 0x20a   :  { %v2176_v36 = vpop.eup %2175  ;;  %2195 = vtanh.f32 %v2838_v37  ;;  %v1444_v16 = vadd.f32 %v1428_v30, %v797_v33  ;;  %v1380_v50 = vadd.f32 1.0, %v2174_v51  ;;  %v1378_v37 = vadd.f32 1.0, %v2856_v45 }
 0x20b   :  { %v2178_v28 = vpop.eup %2177  ;;  %v1261_v43 = vadd.f32 1.0, %v2176_v36  ;;  %2197 = vpow2.f32 %v1735_v21  ;;  %v2236_v36 = vld [vmem:[%s2963_s5 + $0x30] sm:$0xff] }
 0x20c   :  { %v2180_v34 = vpop.eup %2179  ;;  %v1269_v22 = vadd.f32 1.0, %v2178_v28  ;;  %2199 = vpow2.f32 %v1743_v9  ;;  %v2237_v28 = vld [vmem:[%s2963_s5 + $0x40] sm:$0xff] }
 0x20d   :  { %v2182_v18 = vpop.eup %2181  ;;  %2201 = vrcp.f32 %v1261_v43 }
 0x20e   :  { %v2184_v62 = vpop.eup %2183  ;;  %2203 = vrcp.f32 %v1269_v22 }
 0x20f   :  { %v2186_v54 = vpop.eup %2185  ;;  %2205 = vrcp.f32 %v1372_v57  ;;  %v1464_v26 = vsub.f32 %v2536_v47, %v2184_v62  ;;  %v1187_v47 = vadd.f32 %v2859_v58, %v2762_v27  ;;  %v2235_v58 = vld [vmem:[%s2963_s5 + $0x50] sm:$0xff] }
 0x210   :  { %v2188_v13 = vpop.eup %2187  ;;  %2207 = vrcp.f32 %v1380_v50  ;;  %v1462_v49 = vsub.f32 %v2516_v40, %v2186_v54  ;;  %v2238_v50 = vld [vmem:[%s2963_s5 + $0x58] sm:$0xff] }
 0x211   :  { %v2190_v52 = vpop.eup %2189  ;;  %v1480_v31 = vmul.f32 %v2828_v23, %v1464_v26  ;;  %v1465_v12 = vsub.f32 %v2542_v48, %v2188_v13  ;;  %2209 = vtanh.f32 %v1436_v4 }
 0x212   :  { %v2192_v1 = vpop.eup %2191  ;;  %v1478_v11 = vmul.f32 %v2780_v17, %v1462_v49  ;;  %v1463_v15 = vsub.f32 %v2523_v41, %v2190_v52  ;;  %2211 = vtanh.f32 %v2840_v53 }
 0x213   :  { %v2194_v45 = vpop.eup %2193  ;;  %v1496_v59 = vadd.f32 %v2184_v62, %v1480_v31  ;;  %v1481_v40 = vmul.f32 %v2164_v60, %v1465_v12  ;;  %v1466_v19 = vsub.f32 %v2556_v55, %v2192_v1  ;;  %2213 = vtanh.f32 %v2854_v10 }
 0x214   :  { %v2196_v23 = vpop.eup %2195  ;;  %v1494_v48 = vadd.f32 %v2186_v54, %v1478_v11  ;;  %v1479_v32 = vmul.f32 %v2797_v0, %v1463_v15  ;;  %v1467_v17 = vsub.f32 %v2562_v56, %v2194_v45  ;;  %2215 = vtanh.f32 %v2850_v14  ;;  %v2239_v54 = vld [vmem:[%s2963_s5 + $0x48] sm:$0xff] }
 0x215   :  { %v2198_v41 = vpop.eup %2197  ;;  %1512 = vst [vmem:[#allocation7 + $0x10] sm:$0xff] %v1496_v59  ;;  %v1497_v53 = vadd.f32 %v2188_v13, %v1481_v40  ;;  %v1482_v38 = vmul.f32 %v2180_v34, %v1466_v19  ;;  %v1472_v60 = vsub.f32 %v2235_v58, %v2196_v23  ;;  %2217 = vtanh.f32 %v1444_v16 }
 0x216   :  { %v2200_v55 = vpop.eup %2199  ;;  %1510 = vst [vmem:[#allocation7] sm:$0xff] %v1494_v48  ;;  %v1495_v10 = vadd.f32 %v2190_v52, %v1479_v32  ;;  %v1155_v0 = vadd.f32 %v2811_v3, %v2762_v27  ;;  %v1483_v6 = vmul.f32 %v2182_v18, %v1467_v17  ;;  %2219 = vtanh.f32 %v2868_v63  ;;  %v2970_v27 = vld [vmem:[#allocation12_spill] sm:$0xff]  ;;  %v2240_v52 = vld [vmem:[%s2963_s5 + $0x70] sm:$0xff] }
 0x217   :  { %v2202_v56 = vpop.eup %2201  ;;  %1513 = vst [vmem:[#allocation7 + $0x18] sm:$0xff] %v1497_v53  ;;  %v1498_v14 = vadd.f32 %v2192_v1, %v1482_v38  ;;  %v1488_v25 = vmul.f32 %v2845_v29, %v1472_v60  ;;  %2221 = vtanh.f32 %v2880_v61  ;;  %v800_v3 = vadd.f32 %v2970_v27, %v2742_v5  ;;  %v2243_v38 = vld [vmem:[%s2963_s5 + $0x38] sm:$0xff] }
 0x218   :  { %v2204_v42 = vpop.eup %2203  ;;  %2223 = vrcp.f32 %v1378_v37  ;;  %1511 = vst [vmem:[#allocation7 + $0x8] sm:$0xff] %v1495_v10  ;;  %v1421_v8 = vmul.f32 %v2202_v56, %v1155_v0  ;;  %v1499_v21 = vadd.f32 %v2194_v45, %v1483_v6  ;;  %v1373_v29 = vadd.f32 1.0, %v2198_v41 }
 0x219   :  { %v2206_v2 = vpop.eup %2205  ;;  %2225 = vrcp.f32 %v1379_v39  ;;  %1514 = vst [vmem:[#allocation7 + $0x20] sm:$0xff] %v1498_v14  ;;  %v1504_v63 = vadd.f32 %v2196_v23, %v1488_v25  ;;  %v1429_v35 = vmul.f32 %v2204_v42, %v1187_v47  ;;  %v1381_v30 = vadd.f32 1.0, %v2200_v55  ;;  %v2244_v55 = vld [vmem:[%s2963_s5 + $0x78] sm:$0xff] }
 0x21a   :  { %v2208_v33 = vpop.eup %2207  ;;  %v1437_v9 = vadd.f32 %v1421_v8, %v768_v20  ;;  %1515 = vst [vmem:[#allocation7 + $0x28] sm:$0xff] %v1499_v21 }
 0x21b   :  { %v2210_v61 = vpop.eup %2209  ;;  %1520 = vst [vmem:[#allocation7 + $0x50] sm:$0xff] %v1504_v63  ;;  %v1445_v51 = vadd.f32 %v1429_v35, %v800_v3 }
 0x21c   :  { %v2212_v4 = vpop.eup %2211  ;;  %v1468_v16 = vsub.f32 %v2236_v36, %v2210_v61  ;;  %2227 = vtanh.f32 %v1437_v9 }
 0x21d   :  { %v2214_v5 = vpop.eup %2213  ;;  %v1470_v57 = vsub.f32 %v2237_v28, %v2212_v4  ;;  %2229 = vtanh.f32 %v1445_v51 }
 0x21e   :  { %v2216_v43 = vpop.eup %2215  ;;  %2231 = vrcp.f32 %v1373_v29  ;;  %v1484_v34 = vmul.f32 %v2206_v2, %v1468_v16  ;;  %v1473_v22 = vsub.f32 %v2238_v50, %v2214_v5 }
 0x21f   :  { %v2218_v18 = vpop.eup %2217  ;;  %2233 = vrcp.f32 %v1381_v30  ;;  %v1486_v62 = vmul.f32 %v2784_v44, %v1470_v57  ;;  %v1471_v26 = vsub.f32 %v2239_v54, %v2216_v43  ;;  %v2241_v44 = vld [vmem:[%s2963_s5 + $0x60] sm:$0xff] }
 0x220   :  { %v2220_v13 = vpop.eup %2219  ;;  %v1500_v37 = vadd.f32 %v2210_v61, %v1484_v34  ;;  %v1489_v49 = vmul.f32 %v2874_v24, %v1473_v22  ;;  %v1476_v39 = vsub.f32 %v2240_v52, %v2218_v18  ;;  %v2242_v24 = vld [vmem:[%s2963_s5 + $0x68] sm:$0xff] }
 0x221   :  { %v2222_v31 = vpop.eup %2221  ;;  %v1502_v12 = vadd.f32 %v2212_v4, %v1486_v62  ;;  %v1487_v1 = vmul.f32 %v2809_v46, %v1471_v26  ;;  %v1474_v11 = vsub.f32 %v2241_v44, %v2220_v13 }
 0x222   :  { %v2224_v15 = vpop.eup %2223  ;;  %1516 = vst [vmem:[#allocation7 + $0x30] sm:$0xff] %v1500_v37  ;;  %v1505_v47 = vadd.f32 %v2214_v5, %v1489_v49  ;;  %v1492_v45 = vmul.f32 %v2208_v33, %v1476_v39  ;;  %v1475_v59 = vsub.f32 %v2242_v24, %v2222_v31 }
 0x223   :  { %v2226_v40 = vpop.eup %2225  ;;  %1518 = vst [vmem:[#allocation7 + $0x40] sm:$0xff] %v1502_v12  ;;  %v1503_v19 = vadd.f32 %v2216_v43, %v1487_v1  ;;  %v1490_v23 = vmul.f32 %v2224_v15, %v1474_v11 }
 0x224   :  { %1521 = vst [vmem:[#allocation7 + $0x58] sm:$0xff] %v1505_v47  ;;  %v1508_v46 = vadd.f32 %v2218_v18, %v1492_v45  ;;  %v1491_v48 = vmul.f32 %v2226_v40, %v1475_v59 }
 0x225   :  { %1519 = vst [vmem:[#allocation7 + $0x48] sm:$0xff] %v1503_v19  ;;  %v1506_v32 = vadd.f32 %v2220_v13, %v1490_v23 }
 0x226   :  { %v2228_v17 = vpop.eup %2227  ;;  %1524 = vst [vmem:[#allocation7 + $0x70] sm:$0xff] %v1508_v46  ;;  %v1507_v41 = vadd.f32 %v2222_v31, %v1491_v48 }
 0x227   :  { %v2230_v53 = vpop.eup %2229  ;;  %v1469_v58 = vsub.f32 %v2243_v38, %v2228_v17  ;;  %1522 = vst [vmem:[#allocation7 + $0x60] sm:$0xff] %v1506_v32 }
 0x228   :  { %v2232_v60 = vpop.eup %2231  ;;  %v1477_v10 = vsub.f32 %v2244_v55, %v2230_v53  ;;  %1523 = vst [vmem:[#allocation7 + $0x68] sm:$0xff] %v1507_v41 }
 0x229   :  { %v2234_v0 = vpop.eup %2233  ;;  %v1485_v6 = vmul.f32 %v2232_v60, %v1469_v58 }
 0x22a   :  { %v1493_v56 = vmul.f32 %v2234_v0, %v1477_v10 }
 0x22b   :  { %v1501_v14 = vadd.f32 %v2228_v17, %v1485_v6 }
 0x22c   :  { %v1509_v25 = vadd.f32 %v2230_v53, %v1493_v56 }
 0x22d   :  { %1517 = vst [vmem:[#allocation7 + $0x38] sm:$0xff] %v1501_v14 }
 0x22e   :  { %1525 = vst [vmem:[#allocation7 + $0x78] sm:$0xff] %v1509_v25 }
 0x22f   :  { %2300 = shalt.err (!%p2297_p6)
}
 0x230   :  { %s2301_s30 = scalar_lea.hbm %s2964_s6, 2048 }
 0x231   :  { %p2302_p7 = scmp.ne.s32.totalorder %s2964_s6, %s2301_s30  ;;  %p2305_p8 = scmp.lt.u32.totalorder %s2301_s30, %s2964_s6 }
 0x233   :  { %p2307_p9 = pnand %p2305_p8, %p2302_p7 }
 0x235   :  { %2310 = shalt.err (!%p2307_p9)
}
 0x236   :  { %s2324_s3 = smov 128   ;;  %s2325_s4 = smov 8  }
 0x237   :  { %1537 = dma.vmem_to_hbm [thread:$0]  %s1532_s27, 2048, %s2964_s6, [#allocation4], %s2324_s3, %s2324_s3, %s2325_s4  }
 0x238   :  { %2315 = dma.done.wait [#allocation4], 2048  }
 0x239   :  { %2316 = vsyncadd [#allocation4], 4294965248 }
 0x23a   :  { %1541 = vsyncpa [#allocation3], 1 }
 0x23b   :  { %1542 = vsyncpa [#allocation6], 1 }
 0x23c   :  { %1543 = vsyncpa [#allocation4], 1 }

</bundles_post_ra>
